<compile_context>
chip_gen: v6e
topology: v6e:2x2x1
jax: 0.10.0
libtpu: 0.0.40
codegen_flags: <defaults>
</compile_context>

<pallas_src>
import functools

import jax
import jax.numpy as jnp
from jax.experimental import pallas as pl
from jax.experimental.pallas import tpu as pltpu

_LANE = 128
_HAS_BUFFERED = hasattr(pl, "Buffered")


def _round_up(v, m):
    return ((v + m - 1) // m) * m


def _layernorm(v, w, b, eps=1e-5):
    mu = jnp.mean(v, axis=-1, keepdims=True)
    var = jnp.mean((v - mu) ** 2, axis=-1, keepdims=True)
    return (v - mu) * jax.lax.rsqrt(var + eps) * w + b


def _block_kernel(xf_ref, n1w_ref, n1b_ref,
                  wq_ref, wkT_ref, wv_ref, wo_ref, bo_ref,
                  n2w_ref, n2b_ref, w1_ref, b1_ref, w2_ref, b2_ref,
                  o_ref,
                  xn1_s, kT_s, v_s,
                  *, num_heads, n_valid):
    q_idx = pl.program_id(1)
    N_pad, D = xf_ref.shape[1], xf_ref.shape[2]
    TQ = o_ref.shape[1]
    hd = D // num_heads

    # ---- once per batch element: LN1(x) cache + K^T / V for the whole sequence ----
    @pl.when(q_idx == 0)
    def _():
        xf = xf_ref[0].astype(jnp.float32)                                  # (N_pad, D)
        xfn = _layernorm(xf, n1w_ref[...], n1b_ref[...]).astype(jnp.bfloat16)
        xn1_s[...] = xfn                                                    # reused by every q-tile
        xfnT = xfn.T                                                        # one transpose per batch
        # K^T built directly as Wk^T @ LN1(x)^T: the head split below is a
        # major-dim reshape (no lane relayout) and the score matmul becomes a
        # natural (M,K)x(K,N) contraction with a lane-dense N_pad output.
        kT = jnp.dot(wkT_ref[...], xfnT, preferred_element_type=jnp.float32)  # (D, N_pad)
        kT_s[...] = kT.reshape(num_heads, hd, N_pad).astype(jnp.bfloat16)
        vf = jnp.dot(xfn, wv_ref[...], preferred_element_type=jnp.float32)    # (N_pad, D)
        v_s[...] = jnp.swapaxes(vf.reshape(N_pad, num_heads, hd), 0, 1).astype(jnp.bfloat16)

    # ---- per (batch, q-tile): attention + residual + MLP + residual ----
    q0 = pl.multiple_of(q_idx * TQ, TQ)
    xq = xf_ref[0, pl.ds(q0, TQ), :].astype(jnp.float32)                    # (TQ, D) residual input
    xn = xn1_s[pl.ds(q0, TQ), :]                                            # cached LN1 slab (bf16)

    qp = jnp.dot(xn, wq_ref[...], preferred_element_type=jnp.float32)       # scale pre-folded in Wq
    q3 = jnp.swapaxes(qp.reshape(TQ, num_heads, hd), 0, 1).astype(jnp.bfloat16)   # (H, TQ, hd)
    s = jnp.einsum("hqd,hdn->hqn", q3, kT_s[...],
                   preferred_element_type=jnp.float32)                      # (H, TQ, N_pad)
    if n_valid < N_pad:   # static: mask padded keys (sequence padded to lane-friendly length)
        kmask = jax.lax.broadcasted_iota(jnp.int32, (1, 1, N_pad), 2) < n_valid
        s = jnp.where(kmask, s, -1e30)
    m = jnp.max(s, axis=-1, keepdims=True)
    # bf16 exponent: ~2x EUP throughput on v6e/v7x; denominator kept in f32.
    p = jnp.exp((s - m).astype(jnp.bfloat16))                               # (H, TQ, N_pad) bf16
    inv = pl.reciprocal(jnp.sum(p.astype(jnp.float32), axis=-1, keepdims=True),
                        approx=True)                                        # (H, TQ, 1)
    ctx = jnp.einsum("hqn,hnd->hqd", p, v_s[...],
                     preferred_element_type=jnp.float32) * inv              # (H, TQ, hd)
    ctx = jnp.swapaxes(ctx, 0, 1).reshape(TQ, D).astype(jnp.bfloat16)
    attn = jnp.dot(ctx, wo_ref[...], preferred_element_type=jnp.float32) + bo_ref[...]
    x1 = xq + attn                                                          # residual 1 (f32)

    xn2 = _layernorm(x1, n2w_ref[...], n2b_ref[...]).astype(jnp.bfloat16)
    h1 = jnp.dot(xn2, w1_ref[...], preferred_element_type=jnp.float32) + b1_ref[...]
    # exact GELU (PyTorch nn.GELU default).  On v5e the f32 erf polynomial can
    # become the binding VALU slot; switch to the tanh approximation there if
    # the small numerics delta is acceptable.
    h1 = 0.5 * h1 * (1.0 + jax.lax.erf(h1 * 0.7071067811865476))
    out = x1 + jnp.dot(h1.astype(jnp.bfloat16), w2_ref[...],
                       preferred_element_type=jnp.float32) + b2_ref[...]
    o_ref[0] = out.astype(o_ref.dtype)


def _make_call(B, N_pad, D, hid, num_heads, TQ, dtype, n_valid, single_buffer):
    hd = D // num_heads
    NQ = N_pad // TQ

    def const(shape):
        # Block index never changes: one VMEM buffer is enough (halves the
        # resident-weight footprint -- the headroom that matters on v7x's
        # 64 MiB VMEM).  Falls back to default double-buffering if unsupported.
        if single_buffer:
            return pl.BlockSpec(shape, lambda b, q: (0, 0),
                                pipeline_mode=pl.Buffered(1))
        return pl.BlockSpec(shape, lambda b, q: (0, 0))

    kernel = functools.partial(_block_kernel, num_heads=num_heads, n_valid=n_valid)

    flops = int(2 * B * N_pad * D * 3 * D          # qkv projections
                + 4 * B * N_pad * N_pad * D        # QK^T + PV
                + 2 * B * N_pad * D * D            # output projection
                + 4 * B * N_pad * D * hid)         # MLP
    transcendentals = int(B * num_heads * N_pad * N_pad + B * N_pad * hid)
    bytes_accessed = int(2 * B * N_pad * D * 4                      # x in + out
                         + (4 * D * D + 2 * D * hid) * 2            # bf16 weights (read once)
                         + (2 * hid + 6 * D) * 4)                   # biases / LN rows

    return pl.pallas_call(
        kernel,
        out_shape=jax.ShapeDtypeStruct((B, N_pad, D), dtype),
        grid=(B, NQ),
        in_specs=[
            # x: full (padded) sequence, read once per batch element; the query
            # slab is sliced in-kernel (dedups the old xq/xf double input).
            pl.BlockSpec((1, N_pad, D), lambda b, q: (b, 0, 0)),
            const((1, D)), const((1, D)),                      # norm1 w, b
            const((D, D)), const((D, D)), const((D, D)),       # Wq*scale, Wk^T, Wv
            const((D, D)), const((1, D)),                      # Wproj, bproj
            const((1, D)), const((1, D)),                      # norm2 w, b
            const((D, hid)), const((1, hid)),                  # fc1 weight / bias (VMEM-resident)
            const((hid, D)), const((1, D)),                    # fc2 weight / bias (VMEM-resident)
        ],
        out_specs=pl.BlockSpec((1, TQ, D), lambda b, q: (b, q, 0)),
        scratch_shapes=[
            pltpu.VMEM((N_pad, D), jnp.bfloat16),              # LN1(x) cache
            pltpu.VMEM((num_heads, hd, N_pad), jnp.bfloat16),  # K^T  (H, hd, N)
            pltpu.VMEM((num_heads, N_pad, hd), jnp.bfloat16),  # V    (H, N, hd)
        ],
        compiler_params=pltpu.CompilerParams(
            # Batch axis feeds v7x megacore; the q axis must stay "arbitrary"
            # because the LN1 / K^T / V scratch is built at q==0 and reused.
            dimension_semantics=("parallel", "arbitrary"),
            # ViT-B budget: ~14 MiB single-buffered weights + ~3 MiB K/V/LN1
            # scratch + I/O blocks + score temporaries; 48 MiB is safe on
            # v5e/v6e (128 MiB) and inside v7x's 64 MiB physical VMEM.
            vmem_limit_bytes=48 * 1024 * 1024),
        cost_estimate=pl.CostEstimate(flops=flops,
                                      transcendentals=transcendentals,
                                      bytes_accessed=bytes_accessed),
    )


def block_forward(x, params, modality=None, *, num_heads, q_tile=256):
    """x: (B, N, D) float32.  q_tile: 256 fills the 256-row v6e/v7x MXU;
    pass 128 on v5e or when VMEM-constrained (e.g. ViT-L-class on v7x)."""
    B, N, D = x.shape
    hid = params["mlp_w1"].shape[1]
    assert D % num_heads == 0
    hd = D // num_heads
    scale = hd ** -0.5

    if modality is None:
        n1w, n1b = params["norm1_w"], params["norm1_b"]
        n2w, n2b = params["norm2_w"], params["norm2_b"]
    elif modality == "a":
        n1w, n1b = params["norm1_a_w"], params["norm1_a_b"]
        n2w, n2b = params["norm2_a_w"], params["norm2_a_b"]
    elif modality == "v":
        n1w, n1b = params["norm1_v_w"], params["norm1_v_b"]
        n2w, n2b = params["norm2_v_w"], params["norm2_v_b"]
    else:
        raise ValueError(modality)

    # Pad the sequence so the key/lane axis is dense (e.g. CAV-MAE's 196 visual
    # patches -> 256); padded keys are masked in-kernel and padded query rows
    # are sliced off the output.
    N_pad = _round_up(N, 8 if N <= _LANE else _LANE)
    if N_pad % q_tile == 0:
        TQ = q_tile
    elif N_pad % _LANE == 0:
        TQ = _LANE
    else:
        TQ = N_pad                                  # short sequences: single query tile
    x_in = x if N_pad == N else jnp.pad(x, ((0, 0), (0, N_pad - N), (0, 0)))

    # bf16 matmul operands (f32 MXU accumulation in-kernel); attention scale is
    # folded into Wq and Wk is passed pre-transposed so the kernel builds the
    # K^T cache without an activation-side head transpose.  In a real model this
    # weight prep happens once at load time.
    wqkv = params["attn_qkv_w"]
    wq = (wqkv[:, :D] * scale).astype(jnp.bfloat16)
    wkT = wqkv[:, D:2 * D].T.astype(jnp.bfloat16)
    wv = wqkv[:, 2 * D:].astype(jnp.bfloat16)
    wo = params["attn_proj_w"].astype(jnp.bfloat16)
    w1 = params["mlp_w1"].astype(jnp.bfloat16)      # VMEM-resident: fc1/fc2 are
    w2 = params["mlp_w2"].astype(jnp.bfloat16)      # DMA'd once per pallas_call
    row = lambda a: a.reshape(1, -1).astype(jnp.float32)

    args = (x_in, row(n1w), row(n1b), wq, wkT, wv, wo, row(params["attn_proj_b"]),
            row(n2w), row(n2b), w1, row(params["mlp_b1"]), w2, row(params["mlp_b2"]))

    out = None
    if _HAS_BUFFERED:
        try:
            out = jax.block_until_ready(
                _make_call(B, N_pad, D, hid, num_heads, TQ, x.dtype, N, True)(*args))
        except Exception:   # pl.Buffered(1) not supported by this jax/libtpu build
            out = None
    if out is None:
        out = _make_call(B, N_pad, D, hid, num_heads, TQ, x.dtype, N, False)(*args)
    return out if N_pad == N else out[:, :N, :]


def init_params(key, dim, mlp_ratio=4.0):
    """Deterministic synthetic parameters. Linear weights stored as (in, out)."""
    hid = int(dim * mlp_ratio)
    ks = jax.random.split(key, 8)
    return {
        # three LayerNorm pairs, perturbed so modality selection is observable
        "norm1_w": jnp.ones((dim,), jnp.float32),
        "norm1_b": jnp.zeros((dim,), jnp.float32),
        "norm1_a_w": jnp.ones((dim,), jnp.float32) * 1.1,
        "norm1_a_b": jnp.full((dim,), 0.01, jnp.float32),
        "norm1_v_w": jnp.ones((dim,), jnp.float32) * 0.9,
        "norm1_v_b": jnp.full((dim,), -0.01, jnp.float32),
        "norm2_w": jnp.ones((dim,), jnp.float32),
        "norm2_b": jnp.zeros((dim,), jnp.float32),
        "norm2_a_w": jnp.ones((dim,), jnp.float32) * 1.05,
        "norm2_a_b": jnp.full((dim,), 0.02, jnp.float32),
        "norm2_v_w": jnp.ones((dim,), jnp.float32) * 0.95,
        "norm2_v_b": jnp.full((dim,), -0.02, jnp.float32),
        # attention: qkv (no bias, qkv_bias=False default), proj (with bias)
        "attn_qkv_w": jax.random.normal(ks[0], (dim, 3 * dim), jnp.float32) * 0.05,
        "attn_proj_w": jax.random.normal(ks[1], (dim, dim), jnp.float32) * 0.05,
        "attn_proj_b": jax.random.normal(ks[2], (dim,), jnp.float32) * 0.01,
        # MLP
        "mlp_w1": jax.random.normal(ks[3], (dim, hid), jnp.float32) * 0.05,
        "mlp_b1": jax.random.normal(ks[4], (hid,), jnp.float32) * 0.01,
        "mlp_w2": jax.random.normal(ks[5], (hid, dim), jnp.float32) * 0.05,
        "mlp_b2": jax.random.normal(ks[6], (dim,), jnp.float32) * 0.01,
    }


def block_reference(x, params, modality, num_heads):
    """Pure-JAX f32 reference for verification."""
    B, N, D = x.shape
    hd = D // num_heads
    scale = hd ** -0.5
    if modality is None:
        n1w, n1b, n2w, n2b = (params["norm1_w"], params["norm1_b"],
                              params["norm2_w"], params["norm2_b"])
    elif modality == "a":
        n1w, n1b, n2w, n2b = (params["norm1_a_w"], params["norm1_a_b"],
                              params["norm2_a_w"], params["norm2_a_b"])
    else:
        n1w, n1b, n2w, n2b = (params["norm1_v_w"], params["norm1_v_b"],
                              params["norm2_v_w"], params["norm2_v_b"])

    def ln(v, w, b):
        mu = jnp.mean(v, -1, keepdims=True)
        var = jnp.mean((v - mu) ** 2, -1, keepdims=True)
        return (v - mu) / jnp.sqrt(var + 1e-5) * w + b

    xn = ln(x, n1w, n1b)
    qkv = xn @ params["attn_qkv_w"]
    q, k, v = jnp.split(qkv, 3, axis=-1)
    q = q.reshape(B, N, num_heads, hd).transpose(0, 2, 1, 3)
    k = k.reshape(B, N, num_heads, hd).transpose(0, 2, 1, 3)
    v = v.reshape(B, N, num_heads, hd).transpose(0, 2, 1, 3)
    s = jnp.einsum("bhqd,bhkd->bhqk", q, k) * scale
    p = jax.nn.softmax(s, axis=-1)
    o = jnp.einsum("bhqk,bhkd->bhqd", p, v).transpose(0, 2, 1, 3).reshape(B, N, D)
    o = o @ params["attn_proj_w"] + params["attn_proj_b"]
    x = x + o
    xn2 = ln(x, n2w, n2b)
    h1 = xn2 @ params["mlp_w1"] + params["mlp_b1"]
    h1 = 0.5 * h1 * (1.0 + jax.lax.erf(h1 * 0.7071067811865476))
    return x + h1 @ params["mlp_w2"] + params["mlp_b2"]


if __name__ == "__main__":
    key = jax.random.PRNGKey(0)
    ok = True
    # (B, N, D, H, modalities): N=8 is the clean path; N=12 exercises the
    # pad-to-lane-friendly-length + masked-key path (12 -> 16).
    configs = [(2, 8, 32, 4, (None, "a", "v")),
               (2, 12, 32, 4, ("a",))]
    for cfg_i, (B, N, D, H, modalities) in enumerate(configs):
        kx, kp = jax.random.split(jax.random.fold_in(key, cfg_i))
        x = jax.random.normal(kx, (B, N, D), jnp.float32)
        params = init_params(kp, D, mlp_ratio=4.0)
        for modality in modalities:
            y = jax.block_until_ready(block_forward(x, params, modality, num_heads=H))
            y_ref = block_reference(x, params, modality, H)
            err = float(jnp.max(jnp.abs(y - y_ref)))
            # bf16 matmul operands / bf16 softmax exponent -> loosened tolerance
            if y.shape != x.shape or not jnp.allclose(y, y_ref, atol=2e-2, rtol=2e-2):
                ok = False
                print(f"mismatch N={N} modality={modality}: max abs err {err:.3e}")
    if ok:
        print("KERNEL_OK")
</pallas_src>

<mosaic_0001>
module attributes {stable_mosaic.version = 11 : i64} {
  func.func @_block_kernel(%arg0: i32, %arg1: i32, %arg2: memref<1x8x32xf32, #tpu.memory_space<vmem>>, %arg3: memref<1x32xf32, #tpu.memory_space<vmem>>, %arg4: memref<1x32xf32, #tpu.memory_space<vmem>>, %arg5: memref<32x32xbf16, #tpu.memory_space<vmem>>, %arg6: memref<32x32xbf16, #tpu.memory_space<vmem>>, %arg7: memref<32x32xbf16, #tpu.memory_space<vmem>>, %arg8: memref<32x32xbf16, #tpu.memory_space<vmem>>, %arg9: memref<1x32xf32, #tpu.memory_space<vmem>>, %arg10: memref<1x32xf32, #tpu.memory_space<vmem>>, %arg11: memref<1x32xf32, #tpu.memory_space<vmem>>, %arg12: memref<32x128xbf16, #tpu.memory_space<vmem>>, %arg13: memref<1x128xf32, #tpu.memory_space<vmem>>, %arg14: memref<128x32xbf16, #tpu.memory_space<vmem>>, %arg15: memref<1x32xf32, #tpu.memory_space<vmem>>, %arg16: memref<1x8x32xf32, #tpu.memory_space<vmem>>, %arg17: memref<8x32xbf16, #tpu.memory_space<vmem>>, %arg18: memref<4x8x8xbf16, #tpu.memory_space<vmem>>, %arg19: memref<4x8x8xbf16, #tpu.memory_space<vmem>>) attributes {dimension_semantics = [#tpu.dimension_semantics<parallel>, #tpu.dimension_semantics<arbitrary>], iteration_bounds = array<i64: 2, 1>, scalar_prefetch = 0 : i64, scratch_operands = 3 : i64, tpu.core_type = #tpu.core_type<tc>, window_params = [{transform_indices = @transform_0, window_bounds = array<i64: 1, 8, 32>}, {pipeline_mode = #tpu.pipeline_mode<synchronous>, transform_indices = @transform_1, window_bounds = array<i64: 1, 32>}, {pipeline_mode = #tpu.pipeline_mode<synchronous>, transform_indices = @transform_2, window_bounds = array<i64: 1, 32>}, {pipeline_mode = #tpu.pipeline_mode<synchronous>, transform_indices = @transform_3, window_bounds = array<i64: 32, 32>}, {pipeline_mode = #tpu.pipeline_mode<synchronous>, transform_indices = @transform_4, window_bounds = array<i64: 32, 32>}, {pipeline_mode = #tpu.pipeline_mode<synchronous>, transform_indices = @transform_5, window_bounds = array<i64: 32, 32>}, {pipeline_mode = #tpu.pipeline_mode<synchronous>, transform_indices = @transform_6, window_bounds = array<i64: 32, 32>}, {pipeline_mode = #tpu.pipeline_mode<synchronous>, transform_indices = @transform_7, window_bounds = array<i64: 1, 32>}, {pipeline_mode = #tpu.pipeline_mode<synchronous>, transform_indices = @transform_8, window_bounds = array<i64: 1, 32>}, {pipeline_mode = #tpu.pipeline_mode<synchronous>, transform_indices = @transform_9, window_bounds = array<i64: 1, 32>}, {pipeline_mode = #tpu.pipeline_mode<synchronous>, transform_indices = @transform_10, window_bounds = array<i64: 32, 128>}, {pipeline_mode = #tpu.pipeline_mode<synchronous>, transform_indices = @transform_11, window_bounds = array<i64: 1, 128>}, {pipeline_mode = #tpu.pipeline_mode<synchronous>, transform_indices = @transform_12, window_bounds = array<i64: 128, 32>}, {pipeline_mode = #tpu.pipeline_mode<synchronous>, transform_indices = @transform_13, window_bounds = array<i64: 1, 32>}, {transform_indices = @transform_14, window_bounds = array<i64: 1, 8, 32>}]} {
    %c0_i32 = arith.constant 0 : i32
    %0 = arith.cmpi eq, %arg1, %c0_i32 : i32
    %1 = arith.extui %0 : i1 to i32
    %c0_i32_0 = arith.constant 0 : i32
    %2 = arith.cmpi ne, %1, %c0_i32_0 : i32
    scf.if %2 {
      %c0_45 = arith.constant 0 : index
      %c0_46 = arith.constant 0 : index
      %c0_47 = arith.constant 0 : index
      %88 = vector.load %arg2[%c0_45, %c0_46, %c0_47] : memref<1x8x32xf32, #tpu.memory_space<vmem>>, vector<1x8x32xf32>
      %89 = vector.shape_cast %88 : vector<1x8x32xf32> to vector<8x32xf32>
      %c0_48 = arith.constant 0 : index
      %c0_49 = arith.constant 0 : index
      %90 = vector.load %arg3[%c0_48, %c0_49] : memref<1x32xf32, #tpu.memory_space<vmem>>, vector<1x32xf32>
      %c0_50 = arith.constant 0 : index
      %c0_51 = arith.constant 0 : index
      %91 = vector.load %arg4[%c0_50, %c0_51] : memref<1x32xf32, #tpu.memory_space<vmem>>, vector<1x32xf32>
      %cst_52 = arith.constant dense<0.000000e+00> : vector<8xf32>
      %92 = vector.multi_reduction <add>, %89, %cst_52 [1] : vector<8x32xf32> to vector<8xf32>
      %93 = vector.shape_cast %92 : vector<8xf32> to vector<8x1xf32>
      %cst_53 = arith.constant 3.200000e+01 : f32
      %94 = vector.broadcast %cst_53 : f32 to vector<8x1xf32>
      %95 = arith.divf %93, %94 : vector<8x1xf32>
      %96 = vector.broadcast %95 : vector<8x1xf32> to vector<8x32xf32>
      %97 = arith.subf %89, %96 : vector<8x32xf32>
      %98 = arith.mulf %97, %97 : vector<8x32xf32>
      %cst_54 = arith.constant dense<0.000000e+00> : vector<8xf32>
      %99 = vector.multi_reduction <add>, %98, %cst_54 [1] : vector<8x32xf32> to vector<8xf32>
      %100 = vector.shape_cast %99 : vector<8xf32> to vector<8x1xf32>
      %cst_55 = arith.constant 3.200000e+01 : f32
      %101 = vector.broadcast %cst_55 : f32 to vector<8x1xf32>
      %102 = arith.divf %100, %101 : vector<8x1xf32>
      %103 = vector.broadcast %95 : vector<8x1xf32> to vector<8x32xf32>
      %104 = arith.subf %89, %103 : vector<8x32xf32>
      %cst_56 = arith.constant 9.99999974E-6 : f32
      %105 = vector.broadcast %cst_56 : f32 to vector<8x1xf32>
      %106 = arith.addf %102, %105 : vector<8x1xf32>
      %107 = math.rsqrt %106 : vector<8x1xf32>
      %108 = vector.broadcast %107 : vector<8x1xf32> to vector<8x32xf32>
      %109 = arith.mulf %104, %108 : vector<8x32xf32>
      %110 = vector.broadcast %90 : vector<1x32xf32> to vector<8x32xf32>
      %111 = arith.mulf %109, %110 : vector<8x32xf32>
      %112 = vector.broadcast %91 : vector<1x32xf32> to vector<8x32xf32>
      %113 = arith.addf %111, %112 : vector<8x32xf32>
      %114 = arith.truncf %113 : vector<8x32xf32> to vector<8x32xbf16>
      %c0_57 = arith.constant 0 : index
      %c0_58 = arith.constant 0 : index
      %115 = vector.load %arg17[%c0_57, %c0_58] : memref<8x32xbf16, #tpu.memory_space<vmem>>, vector<8x32xbf16>
      tpu.vector_store %arg17[%c0_57, %c0_58], %114 {strides = array<i32>} : memref<8x32xbf16, #tpu.memory_space<vmem>>, vector<8x32xbf16>,
      %116 = tpu.transpose %114, [1, 0] : vector<8x32xbf16> -> vector<32x8xbf16>
      %c0_59 = arith.constant 0 : index
      %c0_60 = arith.constant 0 : index
      %117 = vector.load %arg6[%c0_59, %c0_60] : memref<32x32xbf16, #tpu.memory_space<vmem>>, vector<32x32xbf16>
      %cst_61 = arith.constant dense<0.000000e+00> : vector<32x8xf32>
      %118 = tpu.matmul %117, %116, %cst_61 {dimension_numbers = #tpu.dot_dimension_numbers<[1], [0], [0], [1], [0, 0, 1, 1], [], []>} : vector<32x32xbf16>, vector<32x8xbf16>, vector<32x8xf32> -> vector<32x8xf32>
      %119 = vector.shape_cast %118 : vector<32x8xf32> to vector<4x8x8xf32>
      %120 = arith.truncf %119 : vector<4x8x8xf32> to vector<4x8x8xbf16>
      %c0_62 = arith.constant 0 : index
      %c0_63 = arith.constant 0 : index
      %c0_64 = arith.constant 0 : index
      %121 = vector.load %arg18[%c0_62, %c0_63, %c0_64] : memref<4x8x8xbf16, #tpu.memory_space<vmem>>, vector<4x8x8xbf16>
      tpu.vector_store %arg18[%c0_62, %c0_63, %c0_64], %120 {strides = array<i32>} : memref<4x8x8xbf16, #tpu.memory_space<vmem>>, vector<4x8x8xbf16>,
      %c0_65 = arith.constant 0 : index
      %c0_66 = arith.constant 0 : index
      %122 = vector.load %arg7[%c0_65, %c0_66] : memref<32x32xbf16, #tpu.memory_space<vmem>>, vector<32x32xbf16>
      %cst_67 = arith.constant dense<0.000000e+00> : vector<8x32xf32>
      %123 = tpu.matmul %114, %122, %cst_67 {dimension_numbers = #tpu.dot_dimension_numbers<[1], [0], [0], [1], [0, 0, 1, 1], [], []>} : vector<8x32xbf16>, vector<32x32xbf16>, vector<8x32xf32> -> vector<8x32xf32>
      %124 = vector.shape_cast %123 : vector<8x32xf32> to vector<8x4x8xf32>
      %125 = tpu.transpose %124, [1, 0, 2] : vector<8x4x8xf32> -> vector<4x8x8xf32>
      %126 = arith.truncf %125 : vector<4x8x8xf32> to vector<4x8x8xbf16>
      %c0_68 = arith.constant 0 : index
      %c0_69 = arith.constant 0 : index
      %c0_70 = arith.constant 0 : index
      %127 = vector.load %arg19[%c0_68, %c0_69, %c0_70] : memref<4x8x8xbf16, #tpu.memory_space<vmem>>, vector<4x8x8xbf16>
      tpu.vector_store %arg19[%c0_68, %c0_69, %c0_70], %126 {strides = array<i32>} : memref<4x8x8xbf16, #tpu.memory_space<vmem>>, vector<4x8x8xbf16>,
    } else {
    }
    %c8_i32 = arith.constant 8 : i32
    %3 = arith.muli %arg1, %c8_i32 : i32
    %4 = tpu.assume_multiple %3, 8 : i32
    %c0 = arith.constant 0 : index
    %5 = arith.index_cast %4 : i32 to index
    %c0_1 = arith.constant 0 : index
    %6 = vector.load %arg2[%c0, %5, %c0_1] : memref<1x8x32xf32, #tpu.memory_space<vmem>>, vector<1x8x32xf32>
    %7 = vector.shape_cast %6 : vector<1x8x32xf32> to vector<8x32xf32>
    %8 = arith.index_cast %4 : i32 to index
    %c0_2 = arith.constant 0 : index
    %9 = vector.load %arg17[%8, %c0_2] : memref<8x32xbf16, #tpu.memory_space<vmem>>, vector<8x32xbf16>
    %c0_3 = arith.constant 0 : index
    %c0_4 = arith.constant 0 : index
    %10 = vector.load %arg5[%c0_3, %c0_4] : memref<32x32xbf16, #tpu.memory_space<vmem>>, vector<32x32xbf16>
    %cst = arith.constant dense<0.000000e+00> : vector<8x32xf32>
    %11 = tpu.matmul %9, %10, %cst {dimension_numbers = #tpu.dot_dimension_numbers<[1], [0], [0], [1], [0, 0, 1, 1], [], []>} : vector<8x32xbf16>, vector<32x32xbf16>, vector<8x32xf32> -> vector<8x32xf32>
    %12 = vector.shape_cast %11 : vector<8x32xf32> to vector<8x4x8xf32>
    %13 = tpu.transpose %12, [1, 0, 2] : vector<8x4x8xf32> -> vector<4x8x8xf32>
    %14 = arith.truncf %13 : vector<4x8x8xf32> to vector<4x8x8xbf16>
    %c0_5 = arith.constant 0 : index
    %c0_6 = arith.constant 0 : index
    %c0_7 = arith.constant 0 : index
    %15 = vector.load %arg18[%c0_5, %c0_6, %c0_7] : memref<4x8x8xbf16, #tpu.memory_space<vmem>>, vector<4x8x8xbf16>
    "tpu.trace_start"() <{level = 10 : i32, message = "hqd,hdn->hqn"}> : () -> ()
    %cst_8 = arith.constant dense<0.000000e+00> : vector<4x8x8xf32>
    %16 = tpu.matmul %14, %15, %cst_8 {dimension_numbers = #tpu.dot_dimension_numbers<[2], [1], [1], [2], [0, 0, 0, 1, 1, 2], [0], [0]>} : vector<4x8x8xbf16>, vector<4x8x8xbf16>, vector<4x8x8xf32> -> vector<4x8x8xf32>
    "tpu.trace_stop"() : () -> ()
    %cst_9 = arith.constant dense<0xFF800000> : vector<4x8xf32>
    %17 = vector.multi_reduction <maximumf>, %16, %cst_9 [2] : vector<4x8x8xf32> to vector<4x8xf32>
    %18 = vector.shape_cast %17 : vector<4x8xf32> to vector<4x8x1xf32>
    %19 = vector.broadcast %18 : vector<4x8x1xf32> to vector<4x8x8xf32>
    %20 = arith.subf %16, %19 : vector<4x8x8xf32>
    %21 = arith.truncf %20 : vector<4x8x8xf32> to vector<4x8x8xbf16>
    %22 = math.exp %21 : vector<4x8x8xbf16>
    %23 = arith.extf %22 : vector<4x8x8xbf16> to vector<4x8x8xf32>
    %cst_10 = arith.constant dense<0.000000e+00> : vector<4x8xf32>
    %24 = vector.multi_reduction <add>, %23, %cst_10 [2] : vector<4x8x8xf32> to vector<4x8xf32>
    %25 = vector.shape_cast %24 : vector<4x8xf32> to vector<4x8x1xf32>
    %26 = tpu.reciprocal %25 {approx = true} : vector<4x8x1xf32> -> vector<4x8x1xf32>
    %c0_11 = arith.constant 0 : index
    %c0_12 = arith.constant 0 : index
    %c0_13 = arith.constant 0 : index
    %27 = vector.load %arg19[%c0_11, %c0_12, %c0_13] : memref<4x8x8xbf16, #tpu.memory_space<vmem>>, vector<4x8x8xbf16>
    "tpu.trace_start"() <{level = 10 : i32, message = "hqn,hnd->hqd"}> : () -> ()
    %cst_14 = arith.constant dense<0.000000e+00> : vector<4x8x8xf32>
    %28 = tpu.matmul %22, %27, %cst_14 {dimension_numbers = #tpu.dot_dimension_numbers<[2], [1], [1], [2], [0, 0, 0, 1, 1, 2], [0], [0]>} : vector<4x8x8xbf16>, vector<4x8x8xbf16>, vector<4x8x8xf32> -> vector<4x8x8xf32>
    "tpu.trace_stop"() : () -> ()
    %29 = vector.broadcast %26 : vector<4x8x1xf32> to vector<4x8x8xf32>
    %30 = arith.mulf %28, %29 : vector<4x8x8xf32>
    %31 = tpu.transpose %30, [1, 0, 2] : vector<4x8x8xf32> -> vector<8x4x8xf32>
    %32 = vector.shape_cast %31 : vector<8x4x8xf32> to vector<8x32xf32>
    %33 = arith.truncf %32 : vector<8x32xf32> to vector<8x32xbf16>
    %c0_15 = arith.constant 0 : index
    %c0_16 = arith.constant 0 : index
    %34 = vector.load %arg8[%c0_15, %c0_16] : memref<32x32xbf16, #tpu.memory_space<vmem>>, vector<32x32xbf16>
    %cst_17 = arith.constant dense<0.000000e+00> : vector<8x32xf32>
    %35 = tpu.matmul %33, %34, %cst_17 {dimension_numbers = #tpu.dot_dimension_numbers<[1], [0], [0], [1], [0, 0, 1, 1], [], []>} : vector<8x32xbf16>, vector<32x32xbf16>, vector<8x32xf32> -> vector<8x32xf32>
    %c0_18 = arith.constant 0 : index
    %c0_19 = arith.constant 0 : index
    %36 = vector.load %arg9[%c0_18, %c0_19] : memref<1x32xf32, #tpu.memory_space<vmem>>, vector<1x32xf32>
    %37 = vector.broadcast %36 : vector<1x32xf32> to vector<8x32xf32>
    %38 = arith.addf %35, %37 : vector<8x32xf32>
    %39 = arith.addf %7, %38 : vector<8x32xf32>
    %c0_20 = arith.constant 0 : index
    %c0_21 = arith.constant 0 : index
    %40 = vector.load %arg10[%c0_20, %c0_21] : memref<1x32xf32, #tpu.memory_space<vmem>>, vector<1x32xf32>
    %c0_22 = arith.constant 0 : index
    %c0_23 = arith.constant 0 : index
    %41 = vector.load %arg11[%c0_22, %c0_23] : memref<1x32xf32, #tpu.memory_space<vmem>>, vector<1x32xf32>
    %cst_24 = arith.constant dense<0.000000e+00> : vector<8xf32>
    %42 = vector.multi_reduction <add>, %39, %cst_24 [1] : vector<8x32xf32> to vector<8xf32>
    %43 = vector.shape_cast %42 : vector<8xf32> to vector<8x1xf32>
    %cst_25 = arith.constant 3.200000e+01 : f32
    %44 = vector.broadcast %cst_25 : f32 to vector<8x1xf32>
    %45 = arith.divf %43, %44 : vector<8x1xf32>
    %46 = vector.broadcast %45 : vector<8x1xf32> to vector<8x32xf32>
    %47 = arith.subf %39, %46 : vector<8x32xf32>
    %48 = arith.mulf %47, %47 : vector<8x32xf32>
    %cst_26 = arith.constant dense<0.000000e+00> : vector<8xf32>
    %49 = vector.multi_reduction <add>, %48, %cst_26 [1] : vector<8x32xf32> to vector<8xf32>
    %50 = vector.shape_cast %49 : vector<8xf32> to vector<8x1xf32>
    %cst_27 = arith.constant 3.200000e+01 : f32
    %51 = vector.broadcast %cst_27 : f32 to vector<8x1xf32>
    %52 = arith.divf %50, %51 : vector<8x1xf32>
    %53 = vector.broadcast %45 : vector<8x1xf32> to vector<8x32xf32>
    %54 = arith.subf %39, %53 : vector<8x32xf32>
    %cst_28 = arith.constant 9.99999974E-6 : f32
    %55 = vector.broadcast %cst_28 : f32 to vector<8x1xf32>
    %56 = arith.addf %52, %55 : vector<8x1xf32>
    %57 = math.rsqrt %56 : vector<8x1xf32>
    %58 = vector.broadcast %57 : vector<8x1xf32> to vector<8x32xf32>
    %59 = arith.mulf %54, %58 : vector<8x32xf32>
    %60 = vector.broadcast %40 : vector<1x32xf32> to vector<8x32xf32>
    %61 = arith.mulf %59, %60 : vector<8x32xf32>
    %62 = vector.broadcast %41 : vector<1x32xf32> to vector<8x32xf32>
    %63 = arith.addf %61, %62 : vector<8x32xf32>
    %64 = arith.truncf %63 : vector<8x32xf32> to vector<8x32xbf16>
    %c0_29 = arith.constant 0 : index
    %c0_30 = arith.constant 0 : index
    %65 = vector.load %arg12[%c0_29, %c0_30] : memref<32x128xbf16, #tpu.memory_space<vmem>>, vector<32x128xbf16>
    %cst_31 = arith.constant dense<0.000000e+00> : vector<8x128xf32>
    %66 = tpu.matmul %64, %65, %cst_31 {dimension_numbers = #tpu.dot_dimension_numbers<[1], [0], [0], [1], [0, 0, 1, 1], [], []>} : vector<8x32xbf16>, vector<32x128xbf16>, vector<8x128xf32> -> vector<8x128xf32>
    %c0_32 = arith.constant 0 : index
    %c0_33 = arith.constant 0 : index
    %67 = vector.load %arg13[%c0_32, %c0_33] : memref<1x128xf32, #tpu.memory_space<vmem>>, vector<1x128xf32>
    %68 = vector.broadcast %67 : vector<1x128xf32> to vector<8x128xf32>
    %69 = arith.addf %66, %68 : vector<8x128xf32>
    %cst_34 = arith.constant 5.000000e-01 : f32
    %70 = vector.broadcast %cst_34 : f32 to vector<8x128xf32>
    %71 = arith.mulf %70, %69 : vector<8x128xf32>
    %cst_35 = arith.constant 0.707106769 : f32
    %72 = vector.broadcast %cst_35 : f32 to vector<8x128xf32>
    %73 = arith.mulf %69, %72 : vector<8x128xf32>
    %74 = math.erf %73 : vector<8x128xf32>
    %cst_36 = arith.constant 1.000000e+00 : f32
    %75 = vector.broadcast %cst_36 : f32 to vector<8x128xf32>
    %76 = arith.addf %75, %74 : vector<8x128xf32>
    %77 = arith.mulf %71, %76 : vector<8x128xf32>
    %78 = arith.truncf %77 : vector<8x128xf32> to vector<8x128xbf16>
    %c0_37 = arith.constant 0 : index
    %c0_38 = arith.constant 0 : index
    %79 = vector.load %arg14[%c0_37, %c0_38] : memref<128x32xbf16, #tpu.memory_space<vmem>>, vector<128x32xbf16>
    %cst_39 = arith.constant dense<0.000000e+00> : vector<8x32xf32>
    %80 = tpu.matmul %78, %79, %cst_39 {dimension_numbers = #tpu.dot_dimension_numbers<[1], [0], [0], [1], [0, 0, 1, 1], [], []>} : vector<8x128xbf16>, vector<128x32xbf16>, vector<8x32xf32> -> vector<8x32xf32>
    %81 = arith.addf %39, %80 : vector<8x32xf32>
    %c0_40 = arith.constant 0 : index
    %c0_41 = arith.constant 0 : index
    %82 = vector.load %arg15[%c0_40, %c0_41] : memref<1x32xf32, #tpu.memory_space<vmem>>, vector<1x32xf32>
    %83 = vector.broadcast %82 : vector<1x32xf32> to vector<8x32xf32>
    %84 = arith.addf %81, %83 : vector<8x32xf32>
    %c0_42 = arith.constant 0 : index
    %c0_43 = arith.constant 0 : index
    %c0_44 = arith.constant 0 : index
    %85 = vector.load %arg16[%c0_42, %c0_43, %c0_44] : memref<1x8x32xf32, #tpu.memory_space<vmem>>, vector<1x8x32xf32>
    %86 = vector.shape_cast %85 : vector<1x8x32xf32> to vector<8x32xf32>
    %87 = vector.shape_cast %84 : vector<8x32xf32> to vector<1x8x32xf32>
    tpu.vector_store %arg16[%c0_42, %c0_43, %c0_44], %87 {strides = array<i32>} : memref<1x8x32xf32, #tpu.memory_space<vmem>>, vector<1x8x32xf32>,
    return
  }
  func.func @transform_0(%arg0: i32, %arg1: i32) -> (i32, i32, i32) {
    %c0_i32 = arith.constant 0 : i32
    %c0_i32_0 = arith.constant 0 : i32
    %c0_i32_1 = arith.constant 0 : i32
    return %arg0, %c0_i32, %c0_i32_0 : i32, i32, i32
  }
  func.func @transform_1(%arg0: i32, %arg1: i32) -> (i32, i32) {
    %c0_i32 = arith.constant 0 : i32
    %c0_i32_0 = arith.constant 0 : i32
    %c0_i32_1 = arith.constant 0 : i32
    return %c0_i32, %c0_i32_0 : i32, i32
  }
  func.func @transform_2(%arg0: i32, %arg1: i32) -> (i32, i32) {
    %c0_i32 = arith.constant 0 : i32
    %c0_i32_0 = arith.constant 0 : i32
    %c0_i32_1 = arith.constant 0 : i32
    return %c0_i32, %c0_i32_0 : i32, i32
  }
  func.func @transform_3(%arg0: i32, %arg1: i32) -> (i32, i32) {
    %c0_i32 = arith.constant 0 : i32
    %c0_i32_0 = arith.constant 0 : i32
    %c0_i32_1 = arith.constant 0 : i32
    return %c0_i32, %c0_i32_0 : i32, i32
  }
  func.func @transform_4(%arg0: i32, %arg1: i32) -> (i32, i32) {
    %c0_i32 = arith.constant 0 : i32
    %c0_i32_0 = arith.constant 0 : i32
    %c0_i32_1 = arith.constant 0 : i32
    return %c0_i32, %c0_i32_0 : i32, i32
  }
  func.func @transform_5(%arg0: i32, %arg1: i32) -> (i32, i32) {
    %c0_i32 = arith.constant 0 : i32
    %c0_i32_0 = arith.constant 0 : i32
    %c0_i32_1 = arith.constant 0 : i32
    return %c0_i32, %c0_i32_0 : i32, i32
  }
  func.func @transform_6(%arg0: i32, %arg1: i32) -> (i32, i32) {
    %c0_i32 = arith.constant 0 : i32
    %c0_i32_0 = arith.constant 0 : i32
    %c0_i32_1 = arith.constant 0 : i32
    return %c0_i32, %c0_i32_0 : i32, i32
  }
  func.func @transform_7(%arg0: i32, %arg1: i32) -> (i32, i32) {
    %c0_i32 = arith.constant 0 : i32
    %c0_i32_0 = arith.constant 0 : i32
    %c0_i32_1 = arith.constant 0 : i32
    return %c0_i32, %c0_i32_0 : i32, i32
  }
  func.func @transform_8(%arg0: i32, %arg1: i32) -> (i32, i32) {
    %c0_i32 = arith.constant 0 : i32
    %c0_i32_0 = arith.constant 0 : i32
    %c0_i32_1 = arith.constant 0 : i32
    return %c0_i32, %c0_i32_0 : i32, i32
  }
  func.func @transform_9(%arg0: i32, %arg1: i32) -> (i32, i32) {
    %c0_i32 = arith.constant 0 : i32
    %c0_i32_0 = arith.constant 0 : i32
    %c0_i32_1 = arith.constant 0 : i32
    return %c0_i32, %c0_i32_0 : i32, i32
  }
  func.func @transform_10(%arg0: i32, %arg1: i32) -> (i32, i32) {
    %c0_i32 = arith.constant 0 : i32
    %c0_i32_0 = arith.constant 0 : i32
    %c0_i32_1 = arith.constant 0 : i32
    return %c0_i32, %c0_i32_0 : i32, i32
  }
  func.func @transform_11(%arg0: i32, %arg1: i32) -> (i32, i32) {
    %c0_i32 = arith.constant 0 : i32
    %c0_i32_0 = arith.constant 0 : i32
    %c0_i32_1 = arith.constant 0 : i32
    return %c0_i32, %c0_i32_0 : i32, i32
  }
  func.func @transform_12(%arg0: i32, %arg1: i32) -> (i32, i32) {
    %c0_i32 = arith.constant 0 : i32
    %c0_i32_0 = arith.constant 0 : i32
    %c0_i32_1 = arith.constant 0 : i32
    return %c0_i32, %c0_i32_0 : i32, i32
  }
  func.func @transform_13(%arg0: i32, %arg1: i32) -> (i32, i32) {
    %c0_i32 = arith.constant 0 : i32
    %c0_i32_0 = arith.constant 0 : i32
    %c0_i32_1 = arith.constant 0 : i32
    return %c0_i32, %c0_i32_0 : i32, i32
  }
  func.func @transform_14(%arg0: i32, %arg1: i32) -> (i32, i32, i32) {
    %c0_i32 = arith.constant 0 : i32
    %c0_i32_0 = arith.constant 0 : i32
    return %arg0, %arg1, %c0_i32 : i32, i32, i32
  }
}

module attributes {stable_mosaic.version = 11 : i64} {
  func.func @_block_kernel(%arg0: i32, %arg1: i32, %arg2: memref<1x8x32xf32, #tpu.memory_space<vmem>>, %arg3: memref<1x32xf32, #tpu.memory_space<vmem>>, %arg4: memref<1x32xf32, #tpu.memory_space<vmem>>, %arg5: memref<32x32xbf16, #tpu.memory_space<vmem>>, %arg6: memref<32x32xbf16, #tpu.memory_space<vmem>>, %arg7: memref<32x32xbf16, #tpu.memory_space<vmem>>, %arg8: memref<32x32xbf16, #tpu.memory_space<vmem>>, %arg9: memref<1x32xf32, #tpu.memory_space<vmem>>, %arg10: memref<1x32xf32, #tpu.memory_space<vmem>>, %arg11: memref<1x32xf32, #tpu.memory_space<vmem>>, %arg12: memref<32x128xbf16, #tpu.memory_space<vmem>>, %arg13: memref<1x128xf32, #tpu.memory_space<vmem>>, %arg14: memref<128x32xbf16, #tpu.memory_space<vmem>>, %arg15: memref<1x32xf32, #tpu.memory_space<vmem>>, %arg16: memref<1x8x32xf32, #tpu.memory_space<vmem>>, %arg17: memref<8x32xbf16, #tpu.memory_space<vmem>>, %arg18: memref<4x8x8xbf16, #tpu.memory_space<vmem>>, %arg19: memref<4x8x8xbf16, #tpu.memory_space<vmem>>) attributes {dimension_semantics = [#tpu.dimension_semantics<parallel>, #tpu.dimension_semantics<arbitrary>], iteration_bounds = array<i64: 2, 1>, scalar_prefetch = 0 : i64, scratch_operands = 3 : i64, tpu.core_type = #tpu.core_type<tc>, window_params = [{transform_indices = @transform_0, window_bounds = array<i64: 1, 8, 32>}, {pipeline_mode = #tpu.pipeline_mode<synchronous>, transform_indices = @transform_1, window_bounds = array<i64: 1, 32>}, {pipeline_mode = #tpu.pipeline_mode<synchronous>, transform_indices = @transform_2, window_bounds = array<i64: 1, 32>}, {pipeline_mode = #tpu.pipeline_mode<synchronous>, transform_indices = @transform_3, window_bounds = array<i64: 32, 32>}, {pipeline_mode = #tpu.pipeline_mode<synchronous>, transform_indices = @transform_4, window_bounds = array<i64: 32, 32>}, {pipeline_mode = #tpu.pipeline_mode<synchronous>, transform_indices = @transform_5, window_bounds = array<i64: 32, 32>}, {pipeline_mode = #tpu.pipeline_mode<synchronous>, transform_indices = @transform_6, window_bounds = array<i64: 32, 32>}, {pipeline_mode = #tpu.pipeline_mode<synchronous>, transform_indices = @transform_7, window_bounds = array<i64: 1, 32>}, {pipeline_mode = #tpu.pipeline_mode<synchronous>, transform_indices = @transform_8, window_bounds = array<i64: 1, 32>}, {pipeline_mode = #tpu.pipeline_mode<synchronous>, transform_indices = @transform_9, window_bounds = array<i64: 1, 32>}, {pipeline_mode = #tpu.pipeline_mode<synchronous>, transform_indices = @transform_10, window_bounds = array<i64: 32, 128>}, {pipeline_mode = #tpu.pipeline_mode<synchronous>, transform_indices = @transform_11, window_bounds = array<i64: 1, 128>}, {pipeline_mode = #tpu.pipeline_mode<synchronous>, transform_indices = @transform_12, window_bounds = array<i64: 128, 32>}, {pipeline_mode = #tpu.pipeline_mode<synchronous>, transform_indices = @transform_13, window_bounds = array<i64: 1, 32>}, {transform_indices = @transform_14, window_bounds = array<i64: 1, 8, 32>}]} {
    %c0_i32 = arith.constant 0 : i32
    %0 = arith.cmpi eq, %arg1, %c0_i32 : i32
    %1 = arith.extui %0 : i1 to i32
    %c0_i32_0 = arith.constant 0 : i32
    %2 = arith.cmpi ne, %1, %c0_i32_0 : i32
    scf.if %2 {
      %c0_45 = arith.constant 0 : index
      %c0_46 = arith.constant 0 : index
      %c0_47 = arith.constant 0 : index
      %88 = vector.load %arg2[%c0_45, %c0_46, %c0_47] : memref<1x8x32xf32, #tpu.memory_space<vmem>>, vector<1x8x32xf32>
      %89 = vector.shape_cast %88 : vector<1x8x32xf32> to vector<8x32xf32>
      %c0_48 = arith.constant 0 : index
      %c0_49 = arith.constant 0 : index
      %90 = vector.load %arg3[%c0_48, %c0_49] : memref<1x32xf32, #tpu.memory_space<vmem>>, vector<1x32xf32>
      %c0_50 = arith.constant 0 : index
      %c0_51 = arith.constant 0 : index
      %91 = vector.load %arg4[%c0_50, %c0_51] : memref<1x32xf32, #tpu.memory_space<vmem>>, vector<1x32xf32>
      %cst_52 = arith.constant dense<0.000000e+00> : vector<8xf32>
      %92 = vector.multi_reduction <add>, %89, %cst_52 [1] : vector<8x32xf32> to vector<8xf32>
      %93 = vector.shape_cast %92 : vector<8xf32> to vector<8x1xf32>
      %cst_53 = arith.constant 3.200000e+01 : f32
      %94 = vector.broadcast %cst_53 : f32 to vector<8x1xf32>
      %95 = arith.divf %93, %94 : vector<8x1xf32>
      %96 = vector.broadcast %95 : vector<8x1xf32> to vector<8x32xf32>
      %97 = arith.subf %89, %96 : vector<8x32xf32>
      %98 = arith.mulf %97, %97 : vector<8x32xf32>
      %cst_54 = arith.constant dense<0.000000e+00> : vector<8xf32>
      %99 = vector.multi_reduction <add>, %98, %cst_54 [1] : vector<8x32xf32> to vector<8xf32>
      %100 = vector.shape_cast %99 : vector<8xf32> to vector<8x1xf32>
      %cst_55 = arith.constant 3.200000e+01 : f32
      %101 = vector.broadcast %cst_55 : f32 to vector<8x1xf32>
      %102 = arith.divf %100, %101 : vector<8x1xf32>
      %103 = vector.broadcast %95 : vector<8x1xf32> to vector<8x32xf32>
      %104 = arith.subf %89, %103 : vector<8x32xf32>
      %cst_56 = arith.constant 9.99999974E-6 : f32
      %105 = vector.broadcast %cst_56 : f32 to vector<8x1xf32>
      %106 = arith.addf %102, %105 : vector<8x1xf32>
      %107 = math.rsqrt %106 : vector<8x1xf32>
      %108 = vector.broadcast %107 : vector<8x1xf32> to vector<8x32xf32>
      %109 = arith.mulf %104, %108 : vector<8x32xf32>
      %110 = vector.broadcast %90 : vector<1x32xf32> to vector<8x32xf32>
      %111 = arith.mulf %109, %110 : vector<8x32xf32>
      %112 = vector.broadcast %91 : vector<1x32xf32> to vector<8x32xf32>
      %113 = arith.addf %111, %112 : vector<8x32xf32>
      %114 = arith.truncf %113 : vector<8x32xf32> to vector<8x32xbf16>
      %c0_57 = arith.constant 0 : index
      %c0_58 = arith.constant 0 : index
      %115 = vector.load %arg17[%c0_57, %c0_58] : memref<8x32xbf16, #tpu.memory_space<vmem>>, vector<8x32xbf16>
      tpu.vector_store %arg17[%c0_57, %c0_58], %114 {strides = array<i32>} : memref<8x32xbf16, #tpu.memory_space<vmem>>, vector<8x32xbf16>,
      %116 = tpu.transpose %114, [1, 0] : vector<8x32xbf16> -> vector<32x8xbf16>
      %c0_59 = arith.constant 0 : index
      %c0_60 = arith.constant 0 : index
      %117 = vector.load %arg6[%c0_59, %c0_60] : memref<32x32xbf16, #tpu.memory_space<vmem>>, vector<32x32xbf16>
      %cst_61 = arith.constant dense<0.000000e+00> : vector<32x8xf32>
      %118 = tpu.matmul %117, %116, %cst_61 {dimension_numbers = #tpu.dot_dimension_numbers<[1], [0], [0], [1], [0, 0, 1, 1], [], []>} : vector<32x32xbf16>, vector<32x8xbf16>, vector<32x8xf32> -> vector<32x8xf32>
      %119 = vector.shape_cast %118 : vector<32x8xf32> to vector<4x8x8xf32>
      %120 = arith.truncf %119 : vector<4x8x8xf32> to vector<4x8x8xbf16>
      %c0_62 = arith.constant 0 : index
      %c0_63 = arith.constant 0 : index
      %c0_64 = arith.constant 0 : index
      %121 = vector.load %arg18[%c0_62, %c0_63, %c0_64] : memref<4x8x8xbf16, #tpu.memory_space<vmem>>, vector<4x8x8xbf16>
      tpu.vector_store %arg18[%c0_62, %c0_63, %c0_64], %120 {strides = array<i32>} : memref<4x8x8xbf16, #tpu.memory_space<vmem>>, vector<4x8x8xbf16>,
      %c0_65 = arith.constant 0 : index
      %c0_66 = arith.constant 0 : index
      %122 = vector.load %arg7[%c0_65, %c0_66] : memref<32x32xbf16, #tpu.memory_space<vmem>>, vector<32x32xbf16>
      %cst_67 = arith.constant dense<0.000000e+00> : vector<8x32xf32>
      %123 = tpu.matmul %114, %122, %cst_67 {dimension_numbers = #tpu.dot_dimension_numbers<[1], [0], [0], [1], [0, 0, 1, 1], [], []>} : vector<8x32xbf16>, vector<32x32xbf16>, vector<8x32xf32> -> vector<8x32xf32>
      %124 = vector.shape_cast %123 : vector<8x32xf32> to vector<8x4x8xf32>
      %125 = tpu.transpose %124, [1, 0, 2] : vector<8x4x8xf32> -> vector<4x8x8xf32>
      %126 = arith.truncf %125 : vector<4x8x8xf32> to vector<4x8x8xbf16>
      %c0_68 = arith.constant 0 : index
      %c0_69 = arith.constant 0 : index
      %c0_70 = arith.constant 0 : index
      %127 = vector.load %arg19[%c0_68, %c0_69, %c0_70] : memref<4x8x8xbf16, #tpu.memory_space<vmem>>, vector<4x8x8xbf16>
      tpu.vector_store %arg19[%c0_68, %c0_69, %c0_70], %126 {strides = array<i32>} : memref<4x8x8xbf16, #tpu.memory_space<vmem>>, vector<4x8x8xbf16>,
    } else {
    }
    %c8_i32 = arith.constant 8 : i32
    %3 = arith.muli %arg1, %c8_i32 : i32
    %4 = tpu.assume_multiple %3, 8 : i32
    %c0 = arith.constant 0 : index
    %5 = arith.index_cast %4 : i32 to index
    %c0_1 = arith.constant 0 : index
    %6 = vector.load %arg2[%c0, %5, %c0_1] : memref<1x8x32xf32, #tpu.memory_space<vmem>>, vector<1x8x32xf32>
    %7 = vector.shape_cast %6 : vector<1x8x32xf32> to vector<8x32xf32>
    %8 = arith.index_cast %4 : i32 to index
    %c0_2 = arith.constant 0 : index
    %9 = vector.load %arg17[%8, %c0_2] : memref<8x32xbf16, #tpu.memory_space<vmem>>, vector<8x32xbf16>
    %c0_3 = arith.constant 0 : index
    %c0_4 = arith.constant 0 : index
    %10 = vector.load %arg5[%c0_3, %c0_4] : memref<32x32xbf16, #tpu.memory_space<vmem>>, vector<32x32xbf16>
    %cst = arith.constant dense<0.000000e+00> : vector<8x32xf32>
    %11 = tpu.matmul %9, %10, %cst {dimension_numbers = #tpu.dot_dimension_numbers<[1], [0], [0], [1], [0, 0, 1, 1], [], []>} : vector<8x32xbf16>, vector<32x32xbf16>, vector<8x32xf32> -> vector<8x32xf32>
    %12 = vector.shape_cast %11 : vector<8x32xf32> to vector<8x4x8xf32>
    %13 = tpu.transpose %12, [1, 0, 2] : vector<8x4x8xf32> -> vector<4x8x8xf32>
    %14 = arith.truncf %13 : vector<4x8x8xf32> to vector<4x8x8xbf16>
    %c0_5 = arith.constant 0 : index
    %c0_6 = arith.constant 0 : index
    %c0_7 = arith.constant 0 : index
    %15 = vector.load %arg18[%c0_5, %c0_6, %c0_7] : memref<4x8x8xbf16, #tpu.memory_space<vmem>>, vector<4x8x8xbf16>
    "tpu.trace_start"() <{level = 10 : i32, message = "hqd,hdn->hqn"}> : () -> ()
    %cst_8 = arith.constant dense<0.000000e+00> : vector<4x8x8xf32>
    %16 = tpu.matmul %14, %15, %cst_8 {dimension_numbers = #tpu.dot_dimension_numbers<[2], [1], [1], [2], [0, 0, 0, 1, 1, 2], [0], [0]>} : vector<4x8x8xbf16>, vector<4x8x8xbf16>, vector<4x8x8xf32> -> vector<4x8x8xf32>
    "tpu.trace_stop"() : () -> ()
    %cst_9 = arith.constant dense<0xFF800000> : vector<4x8xf32>
    %17 = vector.multi_reduction <maximumf>, %16, %cst_9 [2] : vector<4x8x8xf32> to vector<4x8xf32>
    %18 = vector.shape_cast %17 : vector<4x8xf32> to vector<4x8x1xf32>
    %19 = vector.broadcast %18 : vector<4x8x1xf32> to vector<4x8x8xf32>
    %20 = arith.subf %16, %19 : vector<4x8x8xf32>
    %21 = arith.truncf %20 : vector<4x8x8xf32> to vector<4x8x8xbf16>
    %22 = math.exp %21 : vector<4x8x8xbf16>
    %23 = arith.extf %22 : vector<4x8x8xbf16> to vector<4x8x8xf32>
    %cst_10 = arith.constant dense<0.000000e+00> : vector<4x8xf32>
    %24 = vector.multi_reduction <add>, %23, %cst_10 [2] : vector<4x8x8xf32> to vector<4x8xf32>
    %25 = vector.shape_cast %24 : vector<4x8xf32> to vector<4x8x1xf32>
    %26 = tpu.reciprocal %25 {approx = true} : vector<4x8x1xf32> -> vector<4x8x1xf32>
    %c0_11 = arith.constant 0 : index
    %c0_12 = arith.constant 0 : index
    %c0_13 = arith.constant 0 : index
    %27 = vector.load %arg19[%c0_11, %c0_12, %c0_13] : memref<4x8x8xbf16, #tpu.memory_space<vmem>>, vector<4x8x8xbf16>
    "tpu.trace_start"() <{level = 10 : i32, message = "hqn,hnd->hqd"}> : () -> ()
    %cst_14 = arith.constant dense<0.000000e+00> : vector<4x8x8xf32>
    %28 = tpu.matmul %22, %27, %cst_14 {dimension_numbers = #tpu.dot_dimension_numbers<[2], [1], [1], [2], [0, 0, 0, 1, 1, 2], [0], [0]>} : vector<4x8x8xbf16>, vector<4x8x8xbf16>, vector<4x8x8xf32> -> vector<4x8x8xf32>
    "tpu.trace_stop"() : () -> ()
    %29 = vector.broadcast %26 : vector<4x8x1xf32> to vector<4x8x8xf32>
    %30 = arith.mulf %28, %29 : vector<4x8x8xf32>
    %31 = tpu.transpose %30, [1, 0, 2] : vector<4x8x8xf32> -> vector<8x4x8xf32>
    %32 = vector.shape_cast %31 : vector<8x4x8xf32> to vector<8x32xf32>
    %33 = arith.truncf %32 : vector<8x32xf32> to vector<8x32xbf16>
    %c0_15 = arith.constant 0 : index
    %c0_16 = arith.constant 0 : index
    %34 = vector.load %arg8[%c0_15, %c0_16] : memref<32x32xbf16, #tpu.memory_space<vmem>>, vector<32x32xbf16>
    %cst_17 = arith.constant dense<0.000000e+00> : vector<8x32xf32>
    %35 = tpu.matmul %33, %34, %cst_17 {dimension_numbers = #tpu.dot_dimension_numbers<[1], [0], [0], [1], [0, 0, 1, 1], [], []>} : vector<8x32xbf16>, vector<32x32xbf16>, vector<8x32xf32> -> vector<8x32xf32>
    %c0_18 = arith.constant 0 : index
    %c0_19 = arith.constant 0 : index
    %36 = vector.load %arg9[%c0_18, %c0_19] : memref<1x32xf32, #tpu.memory_space<vmem>>, vector<1x32xf32>
    %37 = vector.broadcast %36 : vector<1x32xf32> to vector<8x32xf32>
    %38 = arith.addf %35, %37 : vector<8x32xf32>
    %39 = arith.addf %7, %38 : vector<8x32xf32>
    %c0_20 = arith.constant 0 : index
    %c0_21 = arith.constant 0 : index
    %40 = vector.load %arg10[%c0_20, %c0_21] : memref<1x32xf32, #tpu.memory_space<vmem>>, vector<1x32xf32>
    %c0_22 = arith.constant 0 : index
    %c0_23 = arith.constant 0 : index
    %41 = vector.load %arg11[%c0_22, %c0_23] : memref<1x32xf32, #tpu.memory_space<vmem>>, vector<1x32xf32>
    %cst_24 = arith.constant dense<0.000000e+00> : vector<8xf32>
    %42 = vector.multi_reduction <add>, %39, %cst_24 [1] : vector<8x32xf32> to vector<8xf32>
    %43 = vector.shape_cast %42 : vector<8xf32> to vector<8x1xf32>
    %cst_25 = arith.constant 3.200000e+01 : f32
    %44 = vector.broadcast %cst_25 : f32 to vector<8x1xf32>
    %45 = arith.divf %43, %44 : vector<8x1xf32>
    %46 = vector.broadcast %45 : vector<8x1xf32> to vector<8x32xf32>
    %47 = arith.subf %39, %46 : vector<8x32xf32>
    %48 = arith.mulf %47, %47 : vector<8x32xf32>
    %cst_26 = arith.constant dense<0.000000e+00> : vector<8xf32>
    %49 = vector.multi_reduction <add>, %48, %cst_26 [1] : vector<8x32xf32> to vector<8xf32>
    %50 = vector.shape_cast %49 : vector<8xf32> to vector<8x1xf32>
    %cst_27 = arith.constant 3.200000e+01 : f32
    %51 = vector.broadcast %cst_27 : f32 to vector<8x1xf32>
    %52 = arith.divf %50, %51 : vector<8x1xf32>
    %53 = vector.broadcast %45 : vector<8x1xf32> to vector<8x32xf32>
    %54 = arith.subf %39, %53 : vector<8x32xf32>
    %cst_28 = arith.constant 9.99999974E-6 : f32
    %55 = vector.broadcast %cst_28 : f32 to vector<8x1xf32>
    %56 = arith.addf %52, %55 : vector<8x1xf32>
    %57 = math.rsqrt %56 : vector<8x1xf32>
    %58 = vector.broadcast %57 : vector<8x1xf32> to vector<8x32xf32>
    %59 = arith.mulf %54, %58 : vector<8x32xf32>
    %60 = vector.broadcast %40 : vector<1x32xf32> to vector<8x32xf32>
    %61 = arith.mulf %59, %60 : vector<8x32xf32>
    %62 = vector.broadcast %41 : vector<1x32xf32> to vector<8x32xf32>
    %63 = arith.addf %61, %62 : vector<8x32xf32>
    %64 = arith.truncf %63 : vector<8x32xf32> to vector<8x32xbf16>
    %c0_29 = arith.constant 0 : index
    %c0_30 = arith.constant 0 : index
    %65 = vector.load %arg12[%c0_29, %c0_30] : memref<32x128xbf16, #tpu.memory_space<vmem>>, vector<32x128xbf16>
    %cst_31 = arith.constant dense<0.000000e+00> : vector<8x128xf32>
    %66 = tpu.matmul %64, %65, %cst_31 {dimension_numbers = #tpu.dot_dimension_numbers<[1], [0], [0], [1], [0, 0, 1, 1], [], []>} : vector<8x32xbf16>, vector<32x128xbf16>, vector<8x128xf32> -> vector<8x128xf32>
    %c0_32 = arith.constant 0 : index
    %c0_33 = arith.constant 0 : index
    %67 = vector.load %arg13[%c0_32, %c0_33] : memref<1x128xf32, #tpu.memory_space<vmem>>, vector<1x128xf32>
    %68 = vector.broadcast %67 : vector<1x128xf32> to vector<8x128xf32>
    %69 = arith.addf %66, %68 : vector<8x128xf32>
    %cst_34 = arith.constant 5.000000e-01 : f32
    %70 = vector.broadcast %cst_34 : f32 to vector<8x128xf32>
    %71 = arith.mulf %70, %69 : vector<8x128xf32>
    %cst_35 = arith.constant 0.707106769 : f32
    %72 = vector.broadcast %cst_35 : f32 to vector<8x128xf32>
    %73 = arith.mulf %69, %72 : vector<8x128xf32>
    %74 = math.erf %73 : vector<8x128xf32>
    %cst_36 = arith.constant 1.000000e+00 : f32
    %75 = vector.broadcast %cst_36 : f32 to vector<8x128xf32>
    %76 = arith.addf %75, %74 : vector<8x128xf32>
    %77 = arith.mulf %71, %76 : vector<8x128xf32>
    %78 = arith.truncf %77 : vector<8x128xf32> to vector<8x128xbf16>
    %c0_37 = arith.constant 0 : index
    %c0_38 = arith.constant 0 : index
    %79 = vector.load %arg14[%c0_37, %c0_38] : memref<128x32xbf16, #tpu.memory_space<vmem>>, vector<128x32xbf16>
    %cst_39 = arith.constant dense<0.000000e+00> : vector<8x32xf32>
    %80 = tpu.matmul %78, %79, %cst_39 {dimension_numbers = #tpu.dot_dimension_numbers<[1], [0], [0], [1], [0, 0, 1, 1], [], []>} : vector<8x128xbf16>, vector<128x32xbf16>, vector<8x32xf32> -> vector<8x32xf32>
    %81 = arith.addf %39, %80 : vector<8x32xf32>
    %c0_40 = arith.constant 0 : index
    %c0_41 = arith.constant 0 : index
    %82 = vector.load %arg15[%c0_40, %c0_41] : memref<1x32xf32, #tpu.memory_space<vmem>>, vector<1x32xf32>
    %83 = vector.broadcast %82 : vector<1x32xf32> to vector<8x32xf32>
    %84 = arith.addf %81, %83 : vector<8x32xf32>
    %c0_42 = arith.constant 0 : index
    %c0_43 = arith.constant 0 : index
    %c0_44 = arith.constant 0 : index
    %85 = vector.load %arg16[%c0_42, %c0_43, %c0_44] : memref<1x8x32xf32, #tpu.memory_space<vmem>>, vector<1x8x32xf32>
    %86 = vector.shape_cast %85 : vector<1x8x32xf32> to vector<8x32xf32>
    %87 = vector.shape_cast %84 : vector<8x32xf32> to vector<1x8x32xf32>
    tpu.vector_store %arg16[%c0_42, %c0_43, %c0_44], %87 {strides = array<i32>} : memref<1x8x32xf32, #tpu.memory_space<vmem>>, vector<1x8x32xf32>,
    return
  }
  func.func @transform_0(%arg0: i32, %arg1: i32) -> (i32, i32, i32) {
    %c0_i32 = arith.constant 0 : i32
    %c0_i32_0 = arith.constant 0 : i32
    %c0_i32_1 = arith.constant 0 : i32
    return %arg0, %c0_i32, %c0_i32_0 : i32, i32, i32
  }
  func.func @transform_1(%arg0: i32, %arg1: i32) -> (i32, i32) {
    %c0_i32 = arith.constant 0 : i32
    %c0_i32_0 = arith.constant 0 : i32
    %c0_i32_1 = arith.constant 0 : i32
    return %c0_i32, %c0_i32_0 : i32, i32
  }
  func.func @transform_2(%arg0: i32, %arg1: i32) -> (i32, i32) {
    %c0_i32 = arith.constant 0 : i32
    %c0_i32_0 = arith.constant 0 : i32
    %c0_i32_1 = arith.constant 0 : i32
    return %c0_i32, %c0_i32_0 : i32, i32
  }
  func.func @transform_3(%arg0: i32, %arg1: i32) -> (i32, i32) {
    %c0_i32 = arith.constant 0 : i32
    %c0_i32_0 = arith.constant 0 : i32
    %c0_i32_1 = arith.constant 0 : i32
    return %c0_i32, %c0_i32_0 : i32, i32
  }
  func.func @transform_4(%arg0: i32, %arg1: i32) -> (i32, i32) {
    %c0_i32 = arith.constant 0 : i32
    %c0_i32_0 = arith.constant 0 : i32
    %c0_i32_1 = arith.constant 0 : i32
    return %c0_i32, %c0_i32_0 : i32, i32
  }
  func.func @transform_5(%arg0: i32, %arg1: i32) -> (i32, i32) {
    %c0_i32 = arith.constant 0 : i32
    %c0_i32_0 = arith.constant 0 : i32
    %c0_i32_1 = arith.constant 0 : i32
    return %c0_i32, %c0_i32_0 : i32, i32
  }
  func.func @transform_6(%arg0: i32, %arg1: i32) -> (i32, i32) {
    %c0_i32 = arith.constant 0 : i32
    %c0_i32_0 = arith.constant 0 : i32
    %c0_i32_1 = arith.constant 0 : i32
    return %c0_i32, %c0_i32_0 : i32, i32
  }
  func.func @transform_7(%arg0: i32, %arg1: i32) -> (i32, i32) {
    %c0_i32 = arith.constant 0 : i32
    %c0_i32_0 = arith.constant 0 : i32
    %c0_i32_1 = arith.constant 0 : i32
    return %c0_i32, %c0_i32_0 : i32, i32
  }
  func.func @transform_8(%arg0: i32, %arg1: i32) -> (i32, i32) {
    %c0_i32 = arith.constant 0 : i32
    %c0_i32_0 = arith.constant 0 : i32
    %c0_i32_1 = arith.constant 0 : i32
    return %c0_i32, %c0_i32_0 : i32, i32
  }
  func.func @transform_9(%arg0: i32, %arg1: i32) -> (i32, i32) {
    %c0_i32 = arith.constant 0 : i32
    %c0_i32_0 = arith.constant 0 : i32
    %c0_i32_1 = arith.constant 0 : i32
    return %c0_i32, %c0_i32_0 : i32, i32
  }
  func.func @transform_10(%arg0: i32, %arg1: i32) -> (i32, i32) {
    %c0_i32 = arith.constant 0 : i32
    %c0_i32_0 = arith.constant 0 : i32
    %c0_i32_1 = arith.constant 0 : i32
    return %c0_i32, %c0_i32_0 : i32, i32
  }
  func.func @transform_11(%arg0: i32, %arg1: i32) -> (i32, i32) {
    %c0_i32 = arith.constant 0 : i32
    %c0_i32_0 = arith.constant 0 : i32
    %c0_i32_1 = arith.constant 0 : i32
    return %c0_i32, %c0_i32_0 : i32, i32
  }
  func.func @transform_12(%arg0: i32, %arg1: i32) -> (i32, i32) {
    %c0_i32 = arith.constant 0 : i32
    %c0_i32_0 = arith.constant 0 : i32
    %c0_i32_1 = arith.constant 0 : i32
    return %c0_i32, %c0_i32_0 : i32, i32
  }
  func.func @transform_13(%arg0: i32, %arg1: i32) -> (i32, i32) {
    %c0_i32 = arith.constant 0 : i32
    %c0_i32_0 = arith.constant 0 : i32
    %c0_i32_1 = arith.constant 0 : i32
    return %c0_i32, %c0_i32_0 : i32, i32
  }
  func.func @transform_14(%arg0: i32, %arg1: i32) -> (i32, i32, i32) {
    %c0_i32 = arith.constant 0 : i32
    %c0_i32_0 = arith.constant 0 : i32
    return %arg0, %arg1, %c0_i32 : i32, i32, i32
  }
}

</mosaic_0001>

<bundles_post_ra>
// kernel: tpu_custom_call.1
= control target key start
LH: loop header
LB: loop body
LE: loop exit
PB: predicated region body
PF: predicated region fallthrough
CT: control target
= control target key end

     0   :  { %19 = vsyncpa [#allocation6], 0  ;;  %s2996_s0 = inlined_call_operand.vmem [shape: f32[2,8,32], index: 0, kind: input, shape index: {}]   ;;  %s2997_s1 = inlined_call_operand.vmem [shape: f32[1,32], index: 1, kind: input, shape index: {}]   ;;  %s2998_s2 = inlined_call_operand.vmem [shape: f32[1,32], index: 2, kind: input, shape index: {}]   ;;  %s2999_s3 = inlined_call_operand.vmem [shape: bf16[32,32], index: 3, kind: input, shape index: {}]   ;;  %s3000_s4 = inlined_call_operand.vmem [shape: bf16[32,32], index: 4, kind: input, shape index: {}]   ;;  %s3001_s5 = inlined_call_operand.vmem [shape: bf16[32,32], index: 5, kind: input, shape index: {}]   ;;  %s3002_s6 = inlined_call_operand.vmem [shape: bf16[32,32], index: 6, kind: input, shape index: {}]   ;;  %s3003_s7 = inlined_call_operand.vmem [shape: f32[1,32], index: 7, kind: input, shape index: {}]   ;;  %s3004_s8 = inlined_call_operand.vmem [shape: f32[1,32], index: 8, kind: input, shape index: {}]   ;;  %s3005_s9 = inlined_call_operand.vmem [shape: f32[1,32], index: 9, kind: input, shape index: {}]   ;;  %s3006_s10 = inlined_call_operand.hbm [shape: bf16[32,128], index: 10, kind: input, shape index: {}]   ;;  %s3007_s11 = inlined_call_operand.hbm [shape: f32[1,128], index: 11, kind: input, shape index: {}]   ;;  %s3008_s12 = inlined_call_operand.vmem [shape: bf16[128,32], index: 12, kind: input, shape index: {}]   ;;  %s3009_s13 = inlined_call_operand.vmem [shape: f32[1,32], index: 13, kind: input, shape index: {}]   ;;  %s3010_s14 = inlined_call_operand.hbm [shape: f32[2,8,32], index: 14, kind: output, shape index: {}]  }
   0x1   :  { %20 = vsyncpa [#allocation9], 0 }
   0x2   :  { %21 = vsyncpa [#allocation7], 0 }
   0x3   :  { %23 = vsyncpa [#allocation7 + $0x1], 0  ;;  %s2598_s29 = smov 0   ;;  %s2600_s30 = smov 0  }
   0x4   :  { %s2602_s15 = smov 0   ;;  %s2604_s16 = smov 0  }
   0x5   :  { %s2606_s17 = smov 0   ;;  %s2608_s18 = smov 0  }
   0x6 LB: > { %3018 = sst [smem:[#allocation14_spill]] %s2486_s29  ;;  %s2035_s19 = sadd.s32 4294967295, %s2506_s18   ;;  %s2506_s18 = sphi %s2608_s18, %s29_s18   ;;  %s2502_s17 = sphi %s2606_s17, %s3037_s17   ;;  %s2498_s16 = sphi %s2604_s16, %s3036_s16   ;;  %s2494_s15 = sphi %s2602_s15, %s3035_s15   ;;  %s2490_s30 = sphi %s2600_s30, %s3039_s30   ;;  %s2486_s29 = sphi %s2598_s29, %s3038_s29  }
   0x7   : > { %3019 = sst [smem:[#allocation15_spill]] %s2494_s15  ;;  %s2036_s20 = sadd.s32 4294967294, %s2506_s18  }
   0x8   : > { %3020 = sst [smem:[#allocation16_spill]] %s2502_s17  ;;  %s41_s21 = sadd.s32 1, %s2502_s17 }
   0x9   : > { %3021 = sst [smem:[#allocation17_spill]] %s2506_s18  ;;  %s349_s22 = sadd.s32 1, %s2494_s15 }
   0xa   : > { %p43_p0 = scmp.ge.s32.totalorder %s41_s21, 2  ;;  %p359_p1 = scmp.ne.s32.totalorder %s2494_s15, %s2490_s30 }
   0xb   : > { %p360_p2 = scmp.eq.s32.totalorder %s2035_s19, 1  ;;  %p365_p3 = scmp.ne.s32.totalorder %s2490_s30, %s2486_s29 }
   0xc   : > { %s3041_s21 = smov (%p43_p0, %s41_s21), 0  ;;  %p366_p5 = scmp.eq.s32.totalorder %s2036_s20, 1 }
   0xd   : > { %3022 = sst [smem:[#allocation18_spill]] %s3041_s21  ;;  %p2638_p4 = por %p360_p2, %p359_p1 }
   0xe   : > { %s344_s24 = ssub.s32 %s2502_s17, %s3041_s21  ;;  %p2037_p6 = scmp.ge.s32.totalorder %s2506_s18, 1 }
   0xf   : > { %p347_p7 = scmp.eq.s32.totalorder %s344_s24, 0  ;;  %p2645_p8 = por %p366_p5, %p365_p3 }
  0x10   : > { %p373_p9 = scmp.lt.s32.totalorder %s2506_s18, 3  ;;  %p2657_p11 = scmp.eq.s32.totalorder %s2035_s19, 0 }
  0x11   : > { %s3024_s25 = scalar_select %p2645_p8, 1, 0 }
  0x12   : > { %s2651_s26 = scalar_select %p347_p7, %s2494_s15, %s349_s22  }
  0x13   : > { %3025 = sst [smem:[#allocation19_spill]] %s3024_s25  ;;  %p2653_p10 = pnand %p2037_p6, %p373_p9 }
  0x14   : > { %3026 = sst [smem:[#allocation20_spill]] %s2651_s26  ;;  %s2508_s20 = smov [#allocation5]  }
  0x15   : > { %p2252_p12 = pneg %p2653_p10  ;;  %s412_s24 = sshll.u32 %s2508_s20, 4  ;;  %s413_s24 = int_to_ptr.vmem [resolvable:$true] %s412_s24 }
  0x16   : > { %s2509_s22 = smov [#allocation8]   ;;  %s2381_s19 = scalar_lea.vmem %s413_s24, 256 }
  0x17   : > { %p2665_p13 = pnand %p2657_p11, %p2252_p12  ;;  %s426_s17 = sshll.u32 %s2509_s22, 4  ;;  %s427_s17 = int_to_ptr.vmem [resolvable:$true] %s426_s17 }
  0x18   : > { %p2382_p1 = scmp.ne.s32.totalorder %s413_s24, %s2381_s19  ;;  %p2389_p5 = scmp.lt.s32.totalorder %s413_s24, %s413_s24 }
  0x19   : > { %p2372_p0 = pneg %p2665_p13  ;;  %p2390_p6 = scmp.lt.s32.totalorder %s2381_s19, %s2381_s19 }
  0x1b   : > { %p2384_p2 = pnand %p2382_p1, %p2372_p0  ;;  %p2391_p7 = por %p2390_p6, %p2389_p5 }
  0x1d   : > { %p2385_p3 = pneg %p2384_p2 }
  0x1f   : > { %p2392_p9 = pnand %p2391_p7, %p2385_p3 }
  0x21   : > { %2395 = shalt.err (!%p2392_p9)
}
  0x22   : > { %s2510_s20 = smov 64   ;;  %s2511_s26 = smov 4  }
  0x23   : > { %2255 = dma.hbm_to_vmem [thread:$0]  (!%p2665_p13), %s3006_s10, 256, %s413_s24, [#allocation6], %s2510_s20, %s2510_s20, %s2511_s26  }
  0x24   : > { %s2407_s25 = scalar_lea.vmem %s427_s17, 16  ;;  %s2414_s29 = scalar_lea.vmem %s427_s17, 32 }
  0x25   : > { %p2408_p12 = scmp.ne.s32.totalorder %s427_s17, %s2407_s25  ;;  %p2415_p8 = scmp.lt.s32.totalorder %s427_s17, %s427_s17 }
  0x26   : > { %p2416_p5 = scmp.lt.s32.totalorder %s2414_s29, %s2407_s25 }
  0x27   : > { %p2410_p1 = pnand %p2408_p12, %p2372_p0 }
  0x28   : > { %p2417_p3 = por %p2416_p5, %p2415_p8 }
  0x29   : > { %p2411_p2 = pneg %p2410_p1 }
  0x2b   : > { %p2418_p6 = pnand %p2417_p3, %p2411_p2 }
  0x2d   : > { %2421 = shalt.err (!%p2418_p6)
}
  0x2e   : > { %2258 = dma.hbm_to_vmem [thread:$0]  (!%p2665_p13), %s3007_s11, 16, %s427_s17, [#allocation9]  }
  0x2f   : > { %452 = sbr.rel (%p2653_p10) target bundleno = 2405 (0x965), region = 76 }
  0x34   : > { %2473 = dma.done.wait (%p2657_p11), [#allocation6], 256  }
  0x35   : > { %2475 = vsyncadd (%p2657_p11), [#allocation6], 4294967040 }
  0x36   : > { %2477 = dma.done.wait (%p2657_p11), [#allocation9], 16  }
  0x37   : > { %2479 = vsyncadd (%p2657_p11), [#allocation9], 4294967280  ;;  %p501_p8 = scmp.lt.s32.totalorder %s2498_s16, 1  ;;  %vm513_vm0 = vcmask 261120   ;;  %v2330_v7 = vld [vmem:[%s3000_s4] sm:$0xff]   ;;  %v2512_v8 = vmov 0.0   ;;  %v697_v48 = vlaneseq }
  0x38   : > { %2137 = vmatprep.mubr.msk.bf16.mxu0 %vm513_vm0, %v2330_v7  ;;  %2157 = vmatprep.subr.bf16.mxu1 %v2512_v8  ;;  %vm2513_vm1 = vmmov 0   ;;  %v2046_v13 = vld [vmem:[%s2997_s1] ss:$0 sm:$0xff]  ;;  %vm543_vm2 = vcmask 257024   ;;  %v2331_v20 = vld [vmem:[%s3000_s4 + $0x8] sm:$0xff]   ;;  %vm621_vm3 = vcmask 60416  }
  0x39   : > { %s502_s29 = scalar_select %p501_p8, %s2498_s16, 1  ;;  %2159 = vmatprep.mubr.msk.bf16.mxu1 %vm2513_vm1, %v2512_v8  ;;  %v2047_v15 = vld [vmem:[%s2998_s2] ss:$0 sm:$0xff]  ;;  %v2332_v21 = vld [vmem:[%s3001_s5 + $0x8] sm:$0xff]   ;;  %vm1062_vm4 = vcmask 1043456   ;;  %v698_v52 = vshrl.u32 %v697_v48, 7 }
  0x3a   : > { %v2333_v22 = vld [vmem:[%s3001_s5] sm:$0xff]   ;;  %v2334_v23 = vld [vmem:[%s2999_s3 + $0x8] sm:$0xff]   ;;  %s2514_s28 = smov 104   ;;  %s2515_s24 = smov 120   ;;  %v2517_v46 = vmov 1983009808  }
  0x3b   : > { %s2045_s15 = sshll.u32 %s502_s29, 3  ;;  %v2335_v24 = vld [vmem:[%s2999_s3] sm:$0xff]   ;;  %s2516_s20 = smov 112   ;;  %v695_v47 = vunpack.c.l.s4 %v2517_v46  ;;  %v2518_v49 = vmov 1934713408   ;;  %vm1058_vm5 = vcmask 64512  }
  0x3c   : > { %s504_s21 = scalar_lea.vmem %s2996_s0, %s2045_s15  ;;  %v727_v50 = vunpack.c.l.s4 %v2518_v49  ;;  %s2519_s17 = smov 16   ;;  %vm1637_vm6 = vcmask 130048   ;;  %vm1639_vm7 = vcmask 195584  }
  0x3d   : > { %v2702_v0 = vld [vmem:[%s504_s21] sm:$0xff]  ;;  %v696_v51 = vunpack.c.0.s8 %v695_v47  ;;  %s2520_s18 = smov 8   ;;  %s2521_s21 = smov 24  }
  0x3e   : > { %v514_v1 = vsel %vm513_vm0, %v2702_v0, 0.0  ;;  %v728_v55 = vunpack.c.0.s8 %v727_v50  ;;  %s498_s15 = sand.u32 1, %s2490_s30   ;;  %s2092_s25 = sshll.u32 %s2498_s16, 7 }
  0x3f   : > { %515 = vadd.xlane.f32.xlu0 %v514_v1  ;;  %v2765_v56 = vsub.s32 %v696_v51, %v698_v52  ;;  %s1927_s16 = scalar_lea.sflag [#allocation7], %s498_s15  ;;  %s2522_s19 = smov [#allocation10]  }
  0x40   : > { %v2767_v62 = vsub.s32 %v728_v55, %v698_v52  ;;  %s2426_s29 = sshll.u32 %s2522_s19, 4  ;;  %s2427_s29 = int_to_ptr.vmem [resolvable:$false] %s2426_s29 }
  0xc8   : > { %v516_v2 = vpop.xlane.xlu0 %515 }
  0xc9   : > { %v518_v3 = vmul.f32 0.03125, %v516_v2 }
  0xcb   : > { %v519_v4 = vsub.f32 %v2702_v0, %v518_v3 }
  0xcd   : > { %v520_v5 = vmul.f32 %v519_v4, %v519_v4 }
  0xcf   : > { %v521_v6 = vsel %vm513_vm0, %v520_v5, 0.0 }
  0xd0   : > { %522 = vadd.xlane.f32.xlu0 %v521_v6 }
 0x159   : > { %v523_v9 = vpop.xlane.xlu0 %522 }
 0x15a   : > { %v524_v10 = vmul.f32 0.03125, %v523_v9 }
 0x15c   : > { %v525_v11 = vadd.f32 1e-05, %v524_v10 }
 0x15e   : > { %2348 = vrsqrt.f32 %v525_v11 }
 0x16b   : > { %v2349_v12 = vpop.eup %2348 }
 0x16c   : > { %v527_v14 = vmul.f32 %v2349_v12, %v519_v4 }
 0x16e   : > { %v534_v16 = vmul.f32 %v2046_v13, %v527_v14 }
 0x170   : > { %v541_v17 = vadd.f32 %v2047_v15, %v534_v16 }
 0x172   : > { %v542_v18 = vpack.c.bf16 %v541_v17, %v541_v17 }
 0x174   : > { %544 = vst.msk [vmem:[#allocation2] sm:$0xf] %vm543_vm2, %v542_v18  ;;  %2241 = vmatprep.subr.msk.bf16.mxu0 %vm513_vm0, %v542_v18  ;;  %v566_v19 = vsel %vm513_vm0, %v542_v18, 0 }
 0x175   : > { %2136 = vmatpush3.bf16.xpose.msra.mxu0 %v566_v19 }
 0x176   : > { %2141 = vmatprep.subr.bf16.mxu0 %v2512_v8 }
 0x17b   : > { %v843_v25 = vld [vmem:[#allocation2] sm:$0xf] }
 0x17c   : > { %2138 = vmatmul.mubr.msk.bf16.vlgmr.msra.gmra.mxu0 %vm513_vm0, %v2331_v20 }
 0x17d   : > { %2142 = vmatpush3.bf16.msra.mxu0 %v2332_v21  ;;  %2145 = vmatprep.mubr.msk.bf16.mxu0 %vm2513_vm1, %v2512_v8 }
 0x17e   : > { %2143 = vmatprep.subr.bf16.mxu0 %v2512_v8 }
 0x181   : > { %2144 = vmatpush3.bf16.msra.mxu0 %v2333_v22 }
 0x182   : > { %2149 = vmatprep.subr.bf16.mxu0 %v2512_v8 }
 0x184   : > { %2146 = vmatmul.mubr.msk.bf16.vlgmr.msra.gmra.mxu0 %vm513_vm0, %v542_v18 }
 0x185   : > { %2150 = vmatpush3.bf16.msra.mxu0 %v2334_v23  ;;  %2153 = vmatprep.mubr.msk.bf16.mxu0 %vm2513_vm1, %v2512_v8 }
 0x186   : > { %2151 = vmatprep.subr.bf16.mxu0 %v2512_v8 }
 0x189   : > { %2152 = vmatpush3.bf16.msra.mxu0 %v2335_v24 }
 0x18a   : > { %2163 = vmatprep.subr.bf16.mxu0 %v2512_v8 }
 0x18c   : > { %2154 = vmatmul.mubr.msk.bf16.vlgmr.msra.gmra.mxu0 %vm513_vm0, %v843_v25 }
 0x18d   : > { %2165 = vmatprep.mubr.msk.bf16.mxu0 %vm2513_vm1, %v2512_v8 }
 0x23c   : > { %v2139_v26 = vpop.f32.mrf.mxu0 }
 0x23d   : > { %v619_v27 = vpack.c.bf16 %v2139_v26, %v2139_v26 }
 0x23e   : > { %v602_v28 = vpop.f32.mrf.mxu0 }
 0x23f   : > { %624 = vst.msk [vmem:[#allocation3 + $0x8] sm:$0xf] %vm621_vm3, %v619_v27  ;;  %v617_v29 = vpack.c.bf16 %v602_v28, %v602_v28 }
 0x240   : > { %v2140_v30 = vpop.f32.mrf.mxu0 }
 0x241   : > { %622 = vst.msk [vmem:[#allocation3] sm:$0xf] %vm621_vm3, %v617_v29  ;;  %v620_v31 = vpack.c.bf16 %v2140_v30, %v2140_v30 }
 0x242   : > { %v605_v32 = vpop.f32.mrf.mxu0 }
 0x243   : > { %625 = vst.msk [vmem:[#allocation3 + $0xc] sm:$0xf] %vm621_vm3, %v620_v31  ;;  %v618_v33 = vpack.c.bf16 %v605_v32, %v605_v32 }
 0x244   : > { %v2755_v34 = vpop.f32.mrf.mxu0 }
 0x245   : > { %623 = vst.msk [vmem:[#allocation3 + $0x4] sm:$0xf] %vm621_vm3, %v618_v33 }
 0x246   : > { %v2147_v35 = vpop.f32.mrf.mxu0  ;;  %v1056_v29 = vld [vmem:[#allocation3 + $0x8] sm:$0xf] }
 0x248   : > { %v679_v36 = vpop.f32.mrf.mxu0  ;;  %v1054_v37 = vld [vmem:[#allocation3] sm:$0xf] }
 0x249   : > { %v1064_v38 = vsel %vm1062_vm4, %v1054_v37, 0  ;;  %v1156_v36 = vsel %vm1062_vm4, %v1056_v29, 0 }
 0x24a   : > { %v2148_v39 = vpop.f32.mrf.mxu0  ;;  %2158 = vmatpush3.bf16.msra.mxu1 %v1064_v38  ;;  %v1057_v30 = vld [vmem:[#allocation3 + $0xc] sm:$0xf] }
 0x24b   : > { %2169 = vmatprep.subr.bf16.mxu1 %v2512_v8  ;;  %v1202_v37 = vsel %vm1062_vm4, %v1057_v30, 0 }
 0x24c   : > { %v898_v40 = vpop.f32.mrf.mxu0  ;;  %v1055_v41 = vld [vmem:[#allocation3 + $0x4] sm:$0xf] }
 0x24d   : > { %911 = vrot.lane.b32.xlu0 %v898_v40, %s2514_s28  ;;  %905 = vrot.lane.b32.xlu1 %v898_v40, %s2515_s24  ;;  %v1110_v42 = vsel %vm1062_vm4, %v1055_v41, 0 }
 0x24e   : > { %v2155_v43 = vpop.f32.mrf.mxu0  ;;  %2164 = vmatpush3.bf16.msra.mxu0 %v1110_v42 }
 0x24f   : > { %2175 = vmatprep.subr.bf16.mxu0 %v2512_v8 }
 0x250   : > { %v901_v44 = vpop.f32.mrf.mxu0 }
 0x251   : > { %908 = vrot.lane.b32.xlu1 %v898_v40, %s2516_s20 }
 0x252   : > { %v2156_v45 = vpop.f32.mrf.mxu0 }
 0x255   : > { %683 = vrot.lane.b32.xlu1 %v2755_v34, %s2515_s24 }
 0x2bf   : > { %v912_v53 = vpop.permute.xlu0 %911  ;;  %v906_v54 = vpop.permute.xlu1 %905 }
 0x2c0   : > { %v930_v57 = vcombine.low %v906_v54, %v912_v53  ;;  %v931_v58 = vcombine.high %v906_v54, %v912_v53 }
 0x2c2   : > { %v938_v63 = vrot.slane %v930_v57, %v2765_v56  ;;  %v945_v1 = vrot.slane %v931_v58, %v2765_v56 }
 0x2c3   : > { %v909_v59 = vpop.permute.xlu1 %908 }
 0x2c4   : > { %v914_v60 = vcombine.low %v898_v40, %v909_v59  ;;  %v915_v61 = vcombine.high %v898_v40, %v909_v59 }
 0x2c6   : > { %v922_v2 = vrot.slane %v914_v60, %v2765_v56  ;;  %v929_v3 = vrot.slane %v915_v61, %v2765_v56 }
 0x2c8   : > { %v946_v4 = vcombine.low %v922_v2, %v938_v63  ;;  %v947_v5 = vcombine.high %v922_v2, %v938_v63  ;;  %v962_v6 = vcombine.low %v929_v3, %v945_v1  ;;  %v963_v7 = vcombine.high %v929_v3, %v945_v1  ;;  %v684_v1 = vpop.permute.xlu1 %683 }
 0x2ca   : > { %v954_v9 = vrot.slane %v946_v4, %v2767_v62  ;;  %v961_v10 = vrot.slane %v947_v5, %v2767_v62  ;;  %v970_v11 = vrot.slane %v962_v6, %v2767_v62  ;;  %v977_v12 = vrot.slane %v963_v7, %v2767_v62 }
 0x2cc   : > { %v982_v13 = vcombine.low %v954_v9, %v961_v10  ;;  %v2060_v14 = vcombine.high %v954_v9, %v961_v10  ;;  %v998_v15 = vcombine.low %v970_v11, %v977_v12  ;;  %v2061_v16 = vcombine.high %v970_v11, %v977_v12 }
 0x2ce   : > { %v989_v17 = vrot.slane %v982_v13, %v2765_v56  ;;  %v997_v18 = vrot.slane %v2060_v14, %v2765_v56  ;;  %v1005_v19 = vrot.slane %v998_v15, %v2765_v56  ;;  %v1013_v20 = vrot.slane %v2061_v16, %v2765_v56 }
 0x2d0   : > { %v1014_v21 = vcombine.low %v989_v17, %v997_v18  ;;  %v1030_v22 = vcombine.low %v1005_v19, %v1013_v20  ;;  %v1015_v23 = vcombine.high %v989_v17, %v997_v18  ;;  %v1031_v24 = vcombine.high %v1005_v19, %v1013_v20 }
 0x2d2   : > { %v1022_v25 = vrot.slane %v1014_v21, %v2767_v62  ;;  %v1038_v26 = vrot.slane %v1030_v22, %v2767_v62  ;;  %v1029_v33 = vrot.slane %v1015_v23, %v2767_v62  ;;  %v1045_v35 = vrot.slane %v1031_v24, %v2767_v62 }
 0x2d4   : > { %v1046_v27 = vcombine.low %v1022_v25, %v1038_v26  ;;  %v1047_v28 = vcombine.high %v1022_v25, %v1038_v26  ;;  %v1048_v38 = vcombine.low %v1029_v33, %v1045_v35  ;;  %v1049_v39 = vcombine.high %v1029_v33, %v1045_v35 }
 0x2d6   : > { %v1050_v31 = vpack.c.bf16 %v1046_v27, %v1046_v27  ;;  %v1051_v32 = vpack.c.bf16 %v1047_v28, %v1047_v28  ;;  %v1052_v40 = vpack.c.bf16 %v1048_v38, %v1048_v38  ;;  %v1053_v41 = vpack.c.bf16 %v1049_v39, %v1049_v39 }
 0x2d8   : > { %2160 = vmatmul.mubr.msk.bf16.vlgmr.msra.gmra.mxu1 %vm1058_vm5, %v1050_v31  ;;  %2166 = vmatmul.mubr.msk.bf16.vlgmr.msra.gmra.mxu0 %vm1058_vm5, %v1051_v32 }
 0x2d9   : > { %2170 = vmatpush3.bf16.msra.mxu1 %v1156_v36  ;;  %2176 = vmatpush3.bf16.msra.mxu0 %v1202_v37 }
 0x2da   : > { %2171 = vmatprep.mubr.msk.bf16.mxu1 %vm2513_vm1, %v2512_v8  ;;  %2177 = vmatprep.mubr.msk.bf16.mxu0 %vm2513_vm1, %v2512_v8 }
 0x2db   : > { %2181 = vmatprep.subr.bf16.mxu1 %v2512_v8  ;;  %2187 = vmatprep.subr.bf16.mxu0 %v2512_v8 }
 0x2e0   : > { %2172 = vmatmul.mubr.msk.bf16.vlgmr.msra.gmra.mxu1 %vm1058_vm5, %v1052_v40  ;;  %2178 = vmatmul.mubr.msk.bf16.vlgmr.msra.gmra.mxu0 %vm1058_vm5, %v1053_v41 }
 0x2e1   : > { %2183 = vmatprep.mubr.msk.bf16.mxu1 %vm2513_vm1, %v2512_v8  ;;  %2189 = vmatprep.mubr.msk.bf16.mxu0 %vm2513_vm1, %v2512_v8 }
 0x398   : > { %v1100_v42 = vpop.f32.mrf.mxu1  ;;  %v1146_v43 = vpop.f32.mrf.mxu0 }
 0x399   : > { %v1244_v44 = vsel %vm1058_vm5, %v1100_v42, -inf  ;;  %v1247_v45 = vsel %vm1058_vm5, %v1146_v43, -inf }
 0x39a   : > { %1245 = vmax.xlane.f32.xlu1 %v1244_v44  ;;  %v2161_v46 = vpop.f32.mrf.mxu1  ;;  %1248 = vmax.xlane.f32.xlu0 %v1247_v45  ;;  %v2167_v47 = vpop.f32.mrf.mxu0 }
 0x39c   : > { %v1103_v48 = vpop.f32.mrf.mxu1  ;;  %v1149_v49 = vpop.f32.mrf.mxu0 }
 0x39e   : > { %v2162_v50 = vpop.f32.mrf.mxu1  ;;  %v2168_v51 = vpop.f32.mrf.mxu0 }
 0x3a0   : > { %v2803_v52 = vpop.f32.mrf.mxu1  ;;  %v2805_v53 = vpop.f32.mrf.mxu0 }
 0x3a1   : > { %v1250_v61 = vsel %vm1058_vm5, %v2803_v52, -inf  ;;  %v1253_v63 = vsel %vm1058_vm5, %v2805_v53, -inf }
 0x3a2   : > { %v2173_v54 = vpop.f32.mrf.mxu1  ;;  %v2179_v55 = vpop.f32.mrf.mxu0 }
 0x3a4   : > { %v1195_v57 = vpop.f32.mrf.mxu1  ;;  %v1241_v58 = vpop.f32.mrf.mxu0 }
 0x3a6   : > { %v2174_v59 = vpop.f32.mrf.mxu1  ;;  %v2180_v60 = vpop.f32.mrf.mxu0 }
 0x3ab   : > { %689 = vrot.lane.b32.xlu1 %v2755_v34, %s2514_s28 }
 0x3b0   : > { %686 = vrot.lane.b32.xlu0 %v2755_v34, %s2516_s20  ;;  %s2949_s20 = scalar_lea.hbm %s3010_s14, %s2092_s25 }
 0x3cf   : > { %1251 = vmax.xlane.f32.xlu1 %v1250_v61  ;;  %1254 = vmax.xlane.f32.xlu0 %v1253_v63 }
 0x423   : > { %v1246_v2 = vpop.xlane.xlu1 %1245  ;;  %v1249_v3 = vpop.xlane.xlu0 %1248 }
 0x424   : > { %v1256_v4 = vsub.f32 %v1100_v42, %v1246_v2  ;;  %v1257_v5 = vsub.f32 %v1146_v43, %v1249_v3 }
 0x426   : > { %v1260_v6 = vpack.c.bf16 %v1256_v4, %v1256_v4  ;;  %v1261_v7 = vpack.c.bf16 %v1257_v5, %v1257_v5 }
 0x427   : > { %v690_v9 = vpop.permute.xlu1 %689  ;;  %v687_v10 = vpop.permute.xlu0 %686 }
 0x428   : > { %v1265_v11 = vmul.bf16 1069105081, %v1260_v6  ;;  %v1268_v12 = vmul.bf16 1069105081, %v1261_v7  ;;  %v708_v13 = vcombine.low %v684_v1, %v690_v9  ;;  %v709_v14 = vcombine.high %v684_v1, %v690_v9 }
 0x429   : > { %v692_v15 = vcombine.low %v2755_v34, %v687_v10  ;;  %v693_v16 = vcombine.high %v2755_v34, %v687_v10 }
 0x42a   : > { %2350 = vpow.bf16 %v1265_v11  ;;  %v716_v17 = vrot.slane %v708_v13, %v2765_v56  ;;  %v723_v18 = vrot.slane %v709_v14, %v2765_v56 }
 0x42b   : > { %2352 = vpow.bf16 %v1268_v12  ;;  %v700_v19 = vrot.slane %v692_v15, %v2765_v56  ;;  %v707_v20 = vrot.slane %v693_v16, %v2765_v56 }
 0x42d   : > { %v724_v21 = vcombine.low %v700_v19, %v716_v17  ;;  %v725_v22 = vcombine.high %v700_v19, %v716_v17  ;;  %v740_v23 = vcombine.low %v707_v20, %v723_v18  ;;  %v741_v24 = vcombine.high %v707_v20, %v723_v18 }
 0x42f   : > { %v732_v25 = vrot.slane %v724_v21, %v2767_v62  ;;  %v739_v26 = vrot.slane %v725_v22, %v2767_v62  ;;  %v748_v34 = vrot.slane %v740_v23, %v2767_v62  ;;  %v755_v27 = vrot.slane %v741_v24, %v2767_v62 }
 0x431   : > { %v760_v28 = vcombine.low %v732_v25, %v739_v26  ;;  %v2055_v29 = vcombine.high %v732_v25, %v739_v26  ;;  %v776_v30 = vcombine.low %v748_v34, %v755_v27  ;;  %v2056_v31 = vcombine.high %v748_v34, %v755_v27 }
 0x433   : > { %v767_v32 = vrot.slane %v760_v28, %v2765_v56  ;;  %v775_v33 = vrot.slane %v2055_v29, %v2765_v56  ;;  %v783_v35 = vrot.slane %v776_v30, %v2765_v56  ;;  %v791_v36 = vrot.slane %v2056_v31, %v2765_v56 }
 0x435   : > { %v792_v37 = vcombine.low %v767_v32, %v775_v33  ;;  %v793_v38 = vcombine.high %v767_v32, %v775_v33  ;;  %v808_v39 = vcombine.low %v783_v35, %v791_v36  ;;  %v809_v40 = vcombine.high %v783_v35, %v791_v36 }
 0x437   : > { %v800_v41 = vrot.slane %v792_v37, %v2767_v62  ;;  %v807_v42 = vrot.slane %v793_v38, %v2767_v62  ;;  %v816_v43 = vrot.slane %v808_v39, %v2767_v62  ;;  %v823_v44 = vrot.slane %v809_v40, %v2767_v62 }
 0x438   : > { %v2351_v45 = vpop.eup %2350 }
 0x439   : > { %v2353_v46 = vpop.eup %2352  ;;  %v824_v47 = vcombine.low %v800_v41, %v816_v43  ;;  %v825_v48 = vcombine.high %v800_v41, %v816_v43  ;;  %v826_v49 = vcombine.low %v807_v42, %v823_v44  ;;  %v827_v50 = vcombine.high %v807_v42, %v823_v44 }
 0x43a   : > { %v1276_v51 = vunpack.c.l.bf16 %v2351_v45  ;;  %v1277_v60 = vunpack.c.l.bf16 %v2353_v46 }
 0x43b   : > { %v828_v54 = vpack.c.bf16 %v824_v47, %v824_v47  ;;  %v829_v55 = vpack.c.bf16 %v825_v48, %v825_v48  ;;  %v830_v57 = vpack.c.bf16 %v826_v49, %v826_v49  ;;  %v831_v58 = vpack.c.bf16 %v827_v50, %v827_v50 }
 0x43c   : > { %v1280_v59 = vsel %vm1058_vm5, %v1276_v51, 0.0  ;;  %v1283_v61 = vsel %vm1058_vm5, %v1277_v60, 0.0 }
 0x43d   : > { %832 = vst.msk [vmem:[#allocation4] sm:$0xf] %vm621_vm3, %v828_v54  ;;  %833 = vst.msk [vmem:[#allocation4 + $0x4] sm:$0xf] %vm621_vm3, %v829_v55  ;;  %1281 = vadd.xlane.f32.xlu1 %v1280_v59 }
 0x43e   : > { %834 = vst.msk [vmem:[#allocation4 + $0x8] sm:$0xf] %vm621_vm3, %v830_v57  ;;  %835 = vst.msk [vmem:[#allocation4 + $0xc] sm:$0xf] %vm621_vm3, %v831_v58 }
 0x441   : > { %1284 = vadd.xlane.f32.xlu1 %v1283_v61 }
 0x444   : > { %v1296_v63 = vld [vmem:[#allocation4] sm:$0xf]  ;;  %v1297_v1 = vld [vmem:[#allocation4 + $0x4] sm:$0xf] }
 0x445   : > { %v1304_v2 = vsel %vm1062_vm4, %v1296_v63, 0  ;;  %v1350_v3 = vsel %vm1062_vm4, %v1297_v1, 0  ;;  %v1298_v4 = vld [vmem:[#allocation4 + $0x8] sm:$0xf]  ;;  %v1299_v5 = vld [vmem:[#allocation4 + $0xc] sm:$0xf] }
 0x446   : > { %2182 = vmatpush3.bf16.msra.mxu1 %v1304_v2  ;;  %2188 = vmatpush3.bf16.msra.mxu0 %v1350_v3  ;;  %v1396_v6 = vsel %vm1062_vm4, %v1298_v4, 0  ;;  %v1442_v7 = vsel %vm1062_vm4, %v1299_v5, 0  ;;  %v2336_v2 = vld [vmem:[%s3002_s6 + $0x8] sm:$0xff]  }
 0x447   : > { %2193 = vmatprep.subr.bf16.mxu1 %v2512_v8  ;;  %2199 = vmatprep.subr.bf16.mxu0 %v2512_v8 }
 0x449   : > { %2184 = vmatmul.mubr.msk.bf16.vlgmr.msra.gmra.mxu1 %vm1058_vm5, %v2351_v45  ;;  %2190 = vmatmul.mubr.msk.bf16.vlgmr.msra.gmra.mxu0 %vm1058_vm5, %v2353_v46 }
 0x44a   : > { %2194 = vmatpush3.bf16.msra.mxu1 %v1396_v6  ;;  %2200 = vmatpush3.bf16.msra.mxu0 %v1442_v7 }
 0x44b   : > { %2195 = vmatprep.mubr.msk.bf16.mxu1 %vm2513_vm1, %v2512_v8  ;;  %2201 = vmatprep.mubr.msk.bf16.mxu0 %vm2513_vm1, %v2512_v8 }
 0x44c   : > { %2205 = vmatprep.subr.bf16.mxu1 %v2512_v8  ;;  %2213 = vmatprep.subr.bf16.mxu0 %v2512_v8 }
 0x458   : > { %v1252_v9 = vpop.xlane.xlu1 %1251  ;;  %v1255_v10 = vpop.xlane.xlu0 %1254 }
 0x459   : > { %v1258_v11 = vsub.f32 %v2803_v52, %v1252_v9  ;;  %v1259_v12 = vsub.f32 %v2805_v53, %v1255_v10 }
 0x45b   : > { %v1262_v13 = vpack.c.bf16 %v1258_v11, %v1258_v11  ;;  %v1263_v14 = vpack.c.bf16 %v1259_v12, %v1259_v12  ;;  %v2337_v12 = vld [vmem:[%s3002_s6] sm:$0xff]  }
 0x45d   : > { %v1271_v15 = vmul.bf16 1069105081, %v1262_v13  ;;  %v1274_v16 = vmul.bf16 1069105081, %v1263_v14 }
 0x45f   : > { %2354 = vpow.bf16 %v1271_v15 }
 0x460   : > { %2356 = vpow.bf16 %v1274_v16 }
 0x46d   : > { %v2355_v17 = vpop.eup %2354 }
 0x46e   : > { %v2357_v18 = vpop.eup %2356  ;;  %2196 = vmatmul.mubr.msk.bf16.vlgmr.msra.gmra.mxu1 %vm1058_vm5, %v2355_v17  ;;  %v1278_v19 = vunpack.c.l.bf16 %v2355_v17 }
 0x46f   : > { %2202 = vmatmul.mubr.msk.bf16.vlgmr.msra.gmra.mxu0 %vm1058_vm5, %v2357_v18  ;;  %2209 = vmatprep.mubr.msk.bf16.mxu1 %vm2513_vm1, %v2512_v8  ;;  %v1279_v20 = vunpack.c.l.bf16 %v2357_v18 }
 0x470   : > { %v1286_v52 = vsel %vm1058_vm5, %v1278_v19, 0.0  ;;  %2217 = vmatprep.mubr.msk.bf16.mxu0 %vm2513_vm1, %v2512_v8  ;;  %2206 = vmatpush3.bf16.msra.mxu1 %v2336_v2  ;;  %v2345_v2 = vld [vmem:[%s3008_s12 + $0x10] sm:$0xff]  }
 0x471   : > { %1287 = vadd.xlane.f32.xlu1 %v1286_v52  ;;  %v1289_v53 = vsel %vm1058_vm5, %v1279_v20, 0.0  ;;  %2207 = vmatprep.subr.bf16.mxu1 %v2512_v8 }
 0x474   : > { %2208 = vmatpush3.bf16.msra.mxu1 %v2337_v12 }
 0x475   : > { %1290 = vadd.xlane.f32.xlu1 %v1289_v53  ;;  %2221 = vmatprep.subr.bf16.mxu1 %v2512_v8 }
 0x4c6   : > { %v1282_v34 = vpop.xlane.xlu1 %1281 }
 0x4c7   : > { %2358 = vrcp.f32 %v1282_v34 }
 0x4ca   : > { %v1285_v29 = vpop.xlane.xlu1 %1284 }
 0x4cb   : > { %2360 = vrcp.f32 %v1285_v29 }
 0x4d4   : > { %v2359_v32 = vpop.eup %2358 }
 0x4d8   : > { %v2361_v33 = vpop.eup %2360 }
 0x4fa   : > { %v1288_v30 = vpop.xlane.xlu1 %1287 }
 0x4fb   : > { %2362 = vrcp.f32 %v1288_v30 }
 0x4fe   : > { %v1291_v31 = vpop.xlane.xlu1 %1290 }
 0x4ff   : > { %2364 = vrcp.f32 %v1291_v31  ;;  %v2072_v31 = vld [vmem:[%s3003_s7] ss:$0 sm:$0xff] }
 0x508   : > { %v2363_v35 = vpop.eup %2362 }
 0x509   : > { %v1340_v21 = vpop.f32.mrf.mxu1  ;;  %v1386_v22 = vpop.f32.mrf.mxu0 }
 0x50a   : > { %v1484_v38 = vmul.f32 %v2359_v32, %v1340_v21  ;;  %v1485_v41 = vmul.f32 %v2361_v33, %v1386_v22 }
 0x50b   : > { %v2185_v23 = vpop.f32.mrf.mxu1  ;;  %v2191_v24 = vpop.f32.mrf.mxu0 }
 0x50c   : > { %v2365_v37 = vpop.eup %2364 }
 0x50d   : > { %v1343_v25 = vpop.f32.mrf.mxu1  ;;  %v1389_v26 = vpop.f32.mrf.mxu0 }
 0x50f   : > { %v2186_v27 = vpop.f32.mrf.mxu1  ;;  %v2192_v28 = vpop.f32.mrf.mxu0 }
 0x52e   : > { %v1432_v36 = vpop.f32.mrf.mxu1 }
 0x52f   : > { %v1486_v39 = vmul.f32 %v2363_v35, %v1432_v36  ;;  %v1478_v40 = vpop.f32.mrf.mxu0 }
 0x530   : > { %v1487_v42 = vmul.f32 %v2365_v37, %v1478_v40  ;;  %v2197_v43 = vpop.f32.mrf.mxu1 }
 0x531   : > { %v1488_v44 = vcombine.low %v1484_v38, %v1486_v39  ;;  %v1489_v45 = vcombine.high %v1484_v38, %v1486_v39  ;;  %v2203_v46 = vpop.f32.mrf.mxu0 }
 0x532   : > { %v1504_v47 = vcombine.low %v1485_v41, %v1487_v42  ;;  %v1505_v48 = vcombine.high %v1485_v41, %v1487_v42  ;;  %v1435_v49 = vpop.f32.mrf.mxu1  ;;  %v2339_v46 = vld [vmem:[#allocation5] sm:$0xff]  }
 0x533   : > { %v1496_v50 = vrot.slane %v1488_v44, %v2765_v56  ;;  %v1503_v51 = vrot.slane %v1489_v45, %v2765_v56  ;;  %v1481_v54 = vpop.f32.mrf.mxu0  ;;  %v2338_v45 = vld [vmem:[#allocation5 + $0x8] sm:$0xff]  }
 0x534   : > { %v1512_v55 = vrot.slane %v1504_v47, %v2765_v56  ;;  %v1519_v57 = vrot.slane %v1505_v48, %v2765_v56  ;;  %v2198_v58 = vpop.f32.mrf.mxu1  ;;  %2214 = vmatpush3.bf16.msra.mxu0 %v2338_v45  ;;  %v2341_v47 = vld [vmem:[%s3008_s12 + $0x30] sm:$0xff]   ;;  %v2076_v54 = vld [vmem:[%s3004_s8] ss:$0 sm:$0xff] }
 0x535   : > { %v2204_v59 = vpop.f32.mrf.mxu0  ;;  %2215 = vmatprep.subr.bf16.mxu0 %v2512_v8 }
 0x536   : > { %v1520_v60 = vcombine.low %v1496_v50, %v1512_v55  ;;  %v1521_v61 = vcombine.high %v1496_v50, %v1512_v55  ;;  %v1536_v63 = vcombine.low %v1503_v51, %v1519_v57  ;;  %v1537_v1 = vcombine.high %v1503_v51, %v1519_v57  ;;  %v2077_v57 = vld [vmem:[%s3005_s9] ss:$0 sm:$0xff] }
 0x538   : > { %v1528_v3 = vrot.slane %v1520_v60, %v2767_v62  ;;  %v1535_v4 = vrot.slane %v1521_v61, %v2767_v62  ;;  %v1544_v5 = vrot.slane %v1536_v63, %v2767_v62  ;;  %v1551_v6 = vrot.slane %v1537_v1, %v2767_v62  ;;  %2216 = vmatpush3.bf16.msra.mxu0 %v2339_v46  ;;  %v2342_v61 = vld [vmem:[%s3008_s12 + $0x28] sm:$0xff]   ;;  %v2343_v63 = vld [vmem:[%s3008_s12 + $0x20] sm:$0xff]   ;;  %v2344_v1 = vld [vmem:[%s3008_s12 + $0x18] sm:$0xff]  }
 0x53a   : > { %v1556_v7 = vcombine.low %v1528_v3, %v1535_v4  ;;  %v2070_v9 = vcombine.high %v1528_v3, %v1535_v4  ;;  %v1572_v10 = vcombine.low %v1544_v5, %v1551_v6  ;;  %v2071_v11 = vcombine.high %v1544_v5, %v1551_v6  ;;  %v2346_v3 = vld [vmem:[%s3008_s12 + $0x8] sm:$0xff]   ;;  %v2347_v4 = vld [vmem:[%s3008_s12] sm:$0xff]   ;;  %v2078_v5 = vld [vmem:[#allocation8] ss:$0 sm:$0xff] }
 0x53c   : > { %v1563_v13 = vrot.slane %v1556_v7, %v2765_v56  ;;  %v1571_v14 = vrot.slane %v2070_v9, %v2765_v56  ;;  %v1579_v15 = vrot.slane %v1572_v10, %v2765_v56  ;;  %v1587_v16 = vrot.slane %v2071_v11, %v2765_v56 }
 0x53e   : > { %v1589_v17 = vcombine.high %v1563_v13, %v1571_v14  ;;  %v1605_v18 = vcombine.high %v1579_v15, %v1587_v16  ;;  %v1588_v19 = vcombine.low %v1563_v13, %v1571_v14  ;;  %v1604_v52 = vcombine.low %v1579_v15, %v1587_v16 }
 0x540   : > { %v1603_v20 = vrot.slane %v1589_v17, %v2767_v62  ;;  %v1619_v53 = vrot.slane %v1605_v18, %v2767_v62  ;;  %v1596_v21 = vrot.slane %v1588_v19, %v2767_v62  ;;  %v1612_v22 = vrot.slane %v1604_v52, %v2767_v62  ;;  %v2090_v18 = vld [vmem:[%s3009_s13] ss:$0 sm:$0xff] }
 0x542   : > { %v1622_v23 = vcombine.low %v1603_v20, %v1619_v53  ;;  %v1621_v24 = vcombine.high %v1596_v21, %v1612_v22  ;;  %v1620_v25 = vcombine.low %v1596_v21, %v1612_v22  ;;  %v1623_v56 = vcombine.high %v1603_v20, %v1619_v53 }
 0x544   : > { %1629 = vrot.lane.b32.xlu1 %v1622_v23, %s2519_s17  ;;  %1625 = vrot.lane.b32.xlu0 %v1621_v24, %s2520_s18  ;;  %s2044_s17 = sshll.u32 %s498_s15, 3 }
 0x545   : > { %s500_s26 = scalar_lea.vmem [#allocation10], %s2044_s17  ;;  %s2428_s17 = scalar_lea.vmem %s2427_s29, 256 }
 0x546   : > { %s1941_s27 = sshll.u32 %s500_s26, 4  ;;  %s2951_s27 = int_to_ptr.vmem [resolvable:$true] %s1941_s27 }
 0x547   : > { %s2422_s22 = scalar_lea.vmem %s2951_s27, 128  ;;  %p2429_p0 = scmp.lt.s32.totalorder %s2951_s27, %s2427_s29 }
 0x548   : > { %1633 = vrot.lane.b32.xlu1 %v1623_v56, %s2521_s21  ;;  %p2423_p10 = scmp.ne.s32.totalorder %s2951_s27, %s2422_s22  ;;  %p2430_p7 = scmp.lt.s32.totalorder %s2428_s17, %s2422_s22 }
 0x54a   : > { %p2424_p11 = pnand %p2423_p10, %p2638_p4  ;;  %p2431_p9 = por %p2430_p7, %p2429_p0 }
 0x54c   : > { %p2425_p13 = pneg %p2424_p11 }
 0x54e   : > { %p2432_p12 = pnand %p2431_p9, %p2425_p13 }
 0x5b6   : > { %v1630_v26 = vpop.permute.xlu1 %1629  ;;  %v1626_v34 = vpop.permute.xlu0 %1625 }
 0x5b7   : > { %v1636_v27 = vsel %vm1058_vm5, %v1620_v25, %v1626_v34 }
 0x5b8   : > { %v1638_v29 = vsel %vm1637_vm6, %v1636_v27, %v1630_v26 }
 0x5ba   : > { %v1634_v28 = vpop.permute.xlu1 %1633 }
 0x5bb   : > { %v1640_v30 = vsel %vm1639_vm7, %v1638_v29, %v1634_v28 }
 0x5bc   : > { %v1641_v62 = vpack.c.bf16 %v1640_v30, %v1640_v30 }
 0x5be   : > { %2210 = vmatmul.mubr.msk.bf16.vlgmr.msra.gmra.mxu1 %vm513_vm0, %v1641_v62 }
 0x5bf   : > { %2237 = vmatprep.mubr.msk.bf16.mxu1 %vm2513_vm1, %v2512_v8 }
 0x67e   : > { %v1702_v32 = vpop.f32.mrf.mxu1 }
 0x67f   : > { %v1703_v33 = vadd.f32 %v2072_v31, %v1702_v32 }
 0x680   : > { %v2211_v35 = vpop.f32.mrf.mxu1 }
 0x681   : > { %v2895_v36 = vadd.f32 %v1703_v33, %v2702_v0  ;;  %v2340_v0 = vld [vmem:[%s3008_s12 + $0x38] sm:$0xff]  }
 0x682   : > { %v1705_v37 = vpop.f32.mrf.mxu1  ;;  %2222 = vmatpush3.bf16.msra.mxu1 %v2340_v0 }
 0x683   : > { %v1711_v38 = vsel %vm513_vm0, %v2895_v36, 0.0  ;;  %2223 = vmatprep.subr.bf16.mxu1 %v2512_v8 }
 0x684   : > { %1712 = vadd.xlane.f32.xlu0 %v1711_v38  ;;  %v2212_v39 = vpop.f32.mrf.mxu1 }
 0x686   : > { %2224 = vmatpush3.bf16.msra.mxu1 %v2341_v47 }
 0x687   : > { %2225 = vmatprep.subr.bf16.mxu1 %v2512_v8 }
 0x68a   : > { %2226 = vmatpush3.bf16.msra.mxu1 %v2342_v61 }
 0x68b   : > { %2227 = vmatprep.subr.bf16.mxu1 %v2512_v8 }
 0x68e   : > { %2228 = vmatpush3.bf16.msra.mxu1 %v2343_v63 }
 0x68f   : > { %2229 = vmatprep.subr.bf16.mxu1 %v2512_v8 }
 0x692   : > { %2230 = vmatpush3.bf16.msra.mxu1 %v2344_v1 }
 0x693   : > { %2231 = vmatprep.subr.bf16.mxu1 %v2512_v8 }
 0x696   : > { %2232 = vmatpush3.bf16.msra.mxu1 %v2345_v2 }
 0x697   : > { %2233 = vmatprep.subr.bf16.mxu1 %v2512_v8 }
 0x69a   : > { %2234 = vmatpush3.bf16.msra.mxu1 %v2346_v3 }
 0x69b   : > { %2235 = vmatprep.subr.bf16.mxu1 %v2512_v8 }
 0x69e   : > { %2236 = vmatpush3.bf16.msra.mxu1 %v2347_v4 }
 0x70d   : > { %v1713_v40 = vpop.xlane.xlu0 %1712 }
 0x70e   : > { %v1715_v41 = vmul.f32 0.03125, %v1713_v40 }
 0x710   : > { %v1716_v42 = vsub.f32 %v2895_v36, %v1715_v41 }
 0x712   : > { %v1717_v43 = vmul.f32 %v1716_v42, %v1716_v42 }
 0x714   : > { %v1718_v44 = vsel %vm513_vm0, %v1717_v43, 0.0 }
 0x715   : > { %1719 = vadd.xlane.f32.xlu1 %v1718_v44 }
 0x79e   : > { %v1720_v48 = vpop.xlane.xlu1 %1719 }
 0x79f   : > { %v1721_v49 = vmul.f32 0.03125, %v1720_v48 }
 0x7a1   : > { %v1722_v50 = vadd.f32 1e-05, %v1721_v49 }
 0x7a3   : > { %2366 = vrsqrt.f32 %v1722_v50 }
 0x7b0   : > { %v2367_v51 = vpop.eup %2366 }
 0x7b1   : > { %v1724_v55 = vmul.f32 %v2367_v51, %v1716_v42 }
 0x7b3   : > { %v1731_v58 = vmul.f32 %v2076_v54, %v1724_v55 }
 0x7b5   : > { %v1738_v59 = vadd.f32 %v2077_v57, %v1731_v58 }
 0x7b7   : > { %v1739_v60 = vpack.c.bf16 %v1738_v59, %v1738_v59 }
 0x7b9   : > { %2218 = vmatmul.mubr.msk.bf16.vlgmr.msra.gmra.mxu0 %vm513_vm0, %v1739_v60 }
 0x879   : > { %v1800_v6 = vpop.f32.mrf.mxu0 }
 0x87a   : > { %v1801_v7 = vadd.f32 %v2078_v5, %v1800_v6 }
 0x87b   : > { %v2219_v9 = vpop.f32.mrf.mxu0 }
 0x87c   : > { %v1807_v10 = vmul.f32 0.70710677, %v1801_v7  ;;  %v1806_v14 = vmul.f32 0.5, %v1801_v7 }
 0x87d   : > { %v1803_v11 = vpop.f32.mrf.mxu0 }
 0x87e   : > { %2368 = verf.f32 %v1807_v10 }
 0x87f   : > { %v2220_v12 = vpop.f32.mrf.mxu0 }
 0x88b   : > { %v2369_v13 = vpop.eup %2368 }
 0x88c   : > { %v1809_v15 = vadd.f32 1.0, %v2369_v13 }
 0x88e   : > { %v1810_v16 = vmul.f32 %v1809_v15, %v1806_v14 }
 0x890   : > { %v1811_v8 = vpack.c.bf16 %v1810_v16, %v1810_v16 }
 0x892   : > { %2238 = vmatmul.mubr.bf16.vlgmr.msra.gmra.mxu1 %v1811_v8 }
 0x952   : > { %v1910_v17 = vpop.f32.mrf.mxu1 }
 0x953   : > { %v1916_v19 = vadd.f32 %v1910_v17, %v2895_v36 }
 0x954   : > { %v2239_v52 = vpop.f32.mrf.mxu1 }
 0x955   : > { %v1924_v20 = vadd.f32 %v2090_v18, %v1916_v19 }
 0x956   : > { %v1913_v53 = vpop.f32.mrf.mxu1 }
 0x957   : > { %1925 = vst.msk [vmem:[%s500_s26] sm:$0xff] %vm513_vm0, %v1924_v20 }
 0x958   : > { %v2240_v21 = vpop.f32.mrf.mxu1 }
 0x959   : > { %2435 = shalt.err (!%p2432_p12)
}
 0x95a   : > { %s2436_s18 = scalar_lea.hbm %s2949_s20, 128  ;;  %s2440_s25 = scalar_lea.hbm %s3010_s14, 256 }
 0x95b   : > { %p2437_p1 = scmp.ne.s32.totalorder %s2949_s20, %s2436_s18  ;;  %p2441_p3 = scmp.lt.s32.totalorder %s2949_s20, %s3010_s14 }
 0x95c   : > { %p2442_p6 = scmp.lt.s32.totalorder %s2440_s25, %s2436_s18 }
 0x95d   : > { %p2438_p2 = pnand %p2437_p1, %p2638_p4 }
 0x95e   : > { %p2443_p8 = por %p2442_p6, %p2441_p3 }
 0x95f   : > { %p2439_p5 = pneg %p2438_p2 }
 0x961   : > { %p2444_p10 = pnand %p2443_p8, %p2439_p5 }
 0x963   : > { %2447 = shalt.err (!%p2444_p10)
}
 0x964   : > { %2250 = dma.vmem_to_hbm [thread:$0]  (%p2638_p4), %s2951_s27, 128, %s2949_s20, %s1927_s16  }
 0x965 PF: > { %s3030_s24 = sld [smem:[#allocation17_spill]] }
 0x966   : > { %s3031_s22 = sld [smem:[#allocation14_spill]] }
 0x967   : > { %s3032_s19 = sld [smem:[#allocation19_spill]] }
 0x96b   : > { %p2267_p11 = scmp.ge.s32.totalorder %s3030_s24, 2 }
 0x96c   : > { %s1953_s29 = sand.u32 1, %s3031_s22  }
 0x96d   : > { %p3033_p13 = scmp.ne.s32.totalorder %s3032_s19, 0  ;;  %s1954_s17 = scalar_lea.sflag [#allocation7], %s1953_s29 }
 0x96f   : > { %p2260_p0 = pnand %p2267_p11, %p3033_p13 }
 0x971   : > { %p2261_p7 = pneg %p2260_p0 }
 0x973   : > { %2481 = dma.done.wait (%p2261_p7), %s1954_s17, 128  }
 0x974   : > { %2483 = vsyncadd (%p2261_p7), %s1954_s17, 4294967168  ;;  %s29_s18 = sadd.s32 1, %s3030_s24   ;;  %s3034_s23 = sld [smem:[#allocation15_spill]] }
 0x975   : > { %p26_p9 = scmp.ge.s32.totalorder %s29_s18, 4   ;;  %s3035_s15 = sld [smem:[#allocation20_spill]] }
 0x976   : > { %s3036_s16 = sld [smem:[#allocation16_spill]]  ;;  %s3038_s29 = smov %s2490_s30 }
 0x977   : > { %s3037_s17 = sld [smem:[#allocation18_spill]]  ;;  %28 = sbr.rel (!%p26_p9) target bundleno = 6 (0x6), region = 126 }
 0x97a   : > { %s3039_s30 = smov %s3034_s23 }
 0x97c   :  { %1959 = vsyncpa [#allocation6], 1 }
 0x97d   :  { %1961 = vsyncpa [#allocation6 + $0x1], 1 }
 0x97e   :  { %1962 = vsyncpa [#allocation9], 1 }
 0x97f   :  { %1963 = vsyncpa [#allocation7], 1 }
 0x980   :  { %1965 = vsyncpa [#allocation7 + $0x1], 1 }

// kernel: tpu_custom_call.1
= control target key start
LH: loop header
LB: loop body
LE: loop exit
PB: predicated region body
PF: predicated region fallthrough
CT: control target
= control target key end

     0   :  { %19 = vsyncpa [#allocation6], 0  ;;  %s2996_s0 = inlined_call_operand.vmem [shape: f32[2,8,32], index: 0, kind: input, shape index: {}]   ;;  %s2997_s1 = inlined_call_operand.vmem [shape: f32[1,32], index: 1, kind: input, shape index: {}]   ;;  %s2998_s2 = inlined_call_operand.vmem [shape: f32[1,32], index: 2, kind: input, shape index: {}]   ;;  %s2999_s3 = inlined_call_operand.vmem [shape: bf16[32,32], index: 3, kind: input, shape index: {}]   ;;  %s3000_s4 = inlined_call_operand.vmem [shape: bf16[32,32], index: 4, kind: input, shape index: {}]   ;;  %s3001_s5 = inlined_call_operand.vmem [shape: bf16[32,32], index: 5, kind: input, shape index: {}]   ;;  %s3002_s6 = inlined_call_operand.vmem [shape: bf16[32,32], index: 6, kind: input, shape index: {}]   ;;  %s3003_s7 = inlined_call_operand.vmem [shape: f32[1,32], index: 7, kind: input, shape index: {}]   ;;  %s3004_s8 = inlined_call_operand.vmem [shape: f32[1,32], index: 8, kind: input, shape index: {}]   ;;  %s3005_s9 = inlined_call_operand.vmem [shape: f32[1,32], index: 9, kind: input, shape index: {}]   ;;  %s3006_s10 = inlined_call_operand.hbm [shape: bf16[32,128], index: 10, kind: input, shape index: {}]   ;;  %s3007_s11 = inlined_call_operand.hbm [shape: f32[1,128], index: 11, kind: input, shape index: {}]   ;;  %s3008_s12 = inlined_call_operand.vmem [shape: bf16[128,32], index: 12, kind: input, shape index: {}]   ;;  %s3009_s13 = inlined_call_operand.vmem [shape: f32[1,32], index: 13, kind: input, shape index: {}]   ;;  %s3010_s14 = inlined_call_operand.hbm [shape: f32[2,8,32], index: 14, kind: output, shape index: {}]  }
   0x1   :  { %20 = vsyncpa [#allocation9], 0 }
   0x2   :  { %21 = vsyncpa [#allocation7], 0 }
   0x3   :  { %23 = vsyncpa [#allocation7 + $0x1], 0  ;;  %s2598_s29 = smov 0   ;;  %s2600_s30 = smov 0  }
   0x4   :  { %s2602_s15 = smov 0   ;;  %s2604_s16 = smov 0  }
   0x5   :  { %s2606_s17 = smov 0   ;;  %s2608_s18 = smov 0  }
   0x6 LB: > { %3018 = sst [smem:[#allocation14_spill]] %s2486_s29  ;;  %s2035_s19 = sadd.s32 4294967295, %s2506_s18   ;;  %s2506_s18 = sphi %s2608_s18, %s29_s18   ;;  %s2502_s17 = sphi %s2606_s17, %s3037_s17   ;;  %s2498_s16 = sphi %s2604_s16, %s3036_s16   ;;  %s2494_s15 = sphi %s2602_s15, %s3035_s15   ;;  %s2490_s30 = sphi %s2600_s30, %s3039_s30   ;;  %s2486_s29 = sphi %s2598_s29, %s3038_s29  }
   0x7   : > { %3019 = sst [smem:[#allocation15_spill]] %s2494_s15  ;;  %s2036_s20 = sadd.s32 4294967294, %s2506_s18  }
   0x8   : > { %3020 = sst [smem:[#allocation16_spill]] %s2502_s17  ;;  %s41_s21 = sadd.s32 1, %s2502_s17 }
   0x9   : > { %3021 = sst [smem:[#allocation17_spill]] %s2506_s18  ;;  %s349_s22 = sadd.s32 1, %s2494_s15 }
   0xa   : > { %p43_p0 = scmp.ge.s32.totalorder %s41_s21, 2  ;;  %p359_p1 = scmp.ne.s32.totalorder %s2494_s15, %s2490_s30 }
   0xb   : > { %p360_p2 = scmp.eq.s32.totalorder %s2035_s19, 1  ;;  %p365_p3 = scmp.ne.s32.totalorder %s2490_s30, %s2486_s29 }
   0xc   : > { %s3041_s21 = smov (%p43_p0, %s41_s21), 0  ;;  %p366_p5 = scmp.eq.s32.totalorder %s2036_s20, 1 }
   0xd   : > { %3022 = sst [smem:[#allocation18_spill]] %s3041_s21  ;;  %p2638_p4 = por %p360_p2, %p359_p1 }
   0xe   : > { %s344_s24 = ssub.s32 %s2502_s17, %s3041_s21  ;;  %p2037_p6 = scmp.ge.s32.totalorder %s2506_s18, 1 }
   0xf   : > { %p347_p7 = scmp.eq.s32.totalorder %s344_s24, 0  ;;  %p2645_p8 = por %p366_p5, %p365_p3 }
  0x10   : > { %p373_p9 = scmp.lt.s32.totalorder %s2506_s18, 3  ;;  %p2657_p11 = scmp.eq.s32.totalorder %s2035_s19, 0 }
  0x11   : > { %s3024_s25 = scalar_select %p2645_p8, 1, 0 }
  0x12   : > { %s2651_s26 = scalar_select %p347_p7, %s2494_s15, %s349_s22  }
  0x13   : > { %3025 = sst [smem:[#allocation19_spill]] %s3024_s25  ;;  %p2653_p10 = pnand %p2037_p6, %p373_p9 }
  0x14   : > { %3026 = sst [smem:[#allocation20_spill]] %s2651_s26  ;;  %s2508_s20 = smov [#allocation5]  }
  0x15   : > { %p2252_p12 = pneg %p2653_p10  ;;  %s412_s24 = sshll.u32 %s2508_s20, 4  ;;  %s413_s24 = int_to_ptr.vmem [resolvable:$true] %s412_s24 }
  0x16   : > { %s2509_s22 = smov [#allocation8]   ;;  %s2381_s19 = scalar_lea.vmem %s413_s24, 256 }
  0x17   : > { %p2665_p13 = pnand %p2657_p11, %p2252_p12  ;;  %s426_s17 = sshll.u32 %s2509_s22, 4  ;;  %s427_s17 = int_to_ptr.vmem [resolvable:$true] %s426_s17 }
  0x18   : > { %p2382_p1 = scmp.ne.s32.totalorder %s413_s24, %s2381_s19  ;;  %p2389_p5 = scmp.lt.s32.totalorder %s413_s24, %s413_s24 }
  0x19   : > { %p2372_p0 = pneg %p2665_p13  ;;  %p2390_p6 = scmp.lt.s32.totalorder %s2381_s19, %s2381_s19 }
  0x1b   : > { %p2384_p2 = pnand %p2382_p1, %p2372_p0  ;;  %p2391_p7 = por %p2390_p6, %p2389_p5 }
  0x1d   : > { %p2385_p3 = pneg %p2384_p2 }
  0x1f   : > { %p2392_p9 = pnand %p2391_p7, %p2385_p3 }
  0x21   : > { %2395 = shalt.err (!%p2392_p9)
}
  0x22   : > { %s2510_s20 = smov 64   ;;  %s2511_s26 = smov 4  }
  0x23   : > { %2255 = dma.hbm_to_vmem [thread:$0]  (!%p2665_p13), %s3006_s10, 256, %s413_s24, [#allocation6], %s2510_s20, %s2510_s20, %s2511_s26  }
  0x24   : > { %s2407_s25 = scalar_lea.vmem %s427_s17, 16  ;;  %s2414_s29 = scalar_lea.vmem %s427_s17, 32 }
  0x25   : > { %p2408_p12 = scmp.ne.s32.totalorder %s427_s17, %s2407_s25  ;;  %p2415_p8 = scmp.lt.s32.totalorder %s427_s17, %s427_s17 }
  0x26   : > { %p2416_p5 = scmp.lt.s32.totalorder %s2414_s29, %s2407_s25 }
  0x27   : > { %p2410_p1 = pnand %p2408_p12, %p2372_p0 }
  0x28   : > { %p2417_p3 = por %p2416_p5, %p2415_p8 }
  0x29   : > { %p2411_p2 = pneg %p2410_p1 }
  0x2b   : > { %p2418_p6 = pnand %p2417_p3, %p2411_p2 }
  0x2d   : > { %2421 = shalt.err (!%p2418_p6)
}
  0x2e   : > { %2258 = dma.hbm_to_vmem [thread:$0]  (!%p2665_p13), %s3007_s11, 16, %s427_s17, [#allocation9]  }
  0x2f   : > { %452 = sbr.rel (%p2653_p10) target bundleno = 2405 (0x965), region = 76 }
  0x34   : > { %2473 = dma.done.wait (%p2657_p11), [#allocation6], 256  }
  0x35   : > { %2475 = vsyncadd (%p2657_p11), [#allocation6], 4294967040 }
  0x36   : > { %2477 = dma.done.wait (%p2657_p11), [#allocation9], 16  }
  0x37   : > { %2479 = vsyncadd (%p2657_p11), [#allocation9], 4294967280  ;;  %p501_p8 = scmp.lt.s32.totalorder %s2498_s16, 1  ;;  %vm513_vm0 = vcmask 261120   ;;  %v2330_v7 = vld [vmem:[%s3000_s4] sm:$0xff]   ;;  %v2512_v8 = vmov 0.0   ;;  %v697_v48 = vlaneseq }
  0x38   : > { %2137 = vmatprep.mubr.msk.bf16.mxu0 %vm513_vm0, %v2330_v7  ;;  %2157 = vmatprep.subr.bf16.mxu1 %v2512_v8  ;;  %vm2513_vm1 = vmmov 0   ;;  %v2046_v13 = vld [vmem:[%s2997_s1] ss:$0 sm:$0xff]  ;;  %vm543_vm2 = vcmask 257024   ;;  %v2331_v20 = vld [vmem:[%s3000_s4 + $0x8] sm:$0xff]   ;;  %vm621_vm3 = vcmask 60416  }
  0x39   : > { %s502_s29 = scalar_select %p501_p8, %s2498_s16, 1  ;;  %2159 = vmatprep.mubr.msk.bf16.mxu1 %vm2513_vm1, %v2512_v8  ;;  %v2047_v15 = vld [vmem:[%s2998_s2] ss:$0 sm:$0xff]  ;;  %v2332_v21 = vld [vmem:[%s3001_s5 + $0x8] sm:$0xff]   ;;  %vm1062_vm4 = vcmask 1043456   ;;  %v698_v52 = vshrl.u32 %v697_v48, 7 }
  0x3a   : > { %v2333_v22 = vld [vmem:[%s3001_s5] sm:$0xff]   ;;  %v2334_v23 = vld [vmem:[%s2999_s3 + $0x8] sm:$0xff]   ;;  %s2514_s28 = smov 104   ;;  %s2515_s24 = smov 120   ;;  %v2517_v46 = vmov 1983009808  }
  0x3b   : > { %s2045_s15 = sshll.u32 %s502_s29, 3  ;;  %v2335_v24 = vld [vmem:[%s2999_s3] sm:$0xff]   ;;  %s2516_s20 = smov 112   ;;  %v695_v47 = vunpack.c.l.s4 %v2517_v46  ;;  %v2518_v49 = vmov 1934713408   ;;  %vm1058_vm5 = vcmask 64512  }
  0x3c   : > { %s504_s21 = scalar_lea.vmem %s2996_s0, %s2045_s15  ;;  %v727_v50 = vunpack.c.l.s4 %v2518_v49  ;;  %s2519_s17 = smov 16   ;;  %vm1637_vm6 = vcmask 130048   ;;  %vm1639_vm7 = vcmask 195584  }
  0x3d   : > { %v2702_v0 = vld [vmem:[%s504_s21] sm:$0xff]  ;;  %v696_v51 = vunpack.c.0.s8 %v695_v47  ;;  %s2520_s18 = smov 8   ;;  %s2521_s21 = smov 24  }
  0x3e   : > { %v514_v1 = vsel %vm513_vm0, %v2702_v0, 0.0  ;;  %v728_v55 = vunpack.c.0.s8 %v727_v50  ;;  %s498_s15 = sand.u32 1, %s2490_s30   ;;  %s2092_s25 = sshll.u32 %s2498_s16, 7 }
  0x3f   : > { %515 = vadd.xlane.f32.xlu0 %v514_v1  ;;  %v2765_v56 = vsub.s32 %v696_v51, %v698_v52  ;;  %s1927_s16 = scalar_lea.sflag [#allocation7], %s498_s15  ;;  %s2522_s19 = smov [#allocation10]  }
  0x40   : > { %v2767_v62 = vsub.s32 %v728_v55, %v698_v52  ;;  %s2426_s29 = sshll.u32 %s2522_s19, 4  ;;  %s2427_s29 = int_to_ptr.vmem [resolvable:$false] %s2426_s29 }
  0xc8   : > { %v516_v2 = vpop.xlane.xlu0 %515 }
  0xc9   : > { %v518_v3 = vmul.f32 0.03125, %v516_v2 }
  0xcb   : > { %v519_v4 = vsub.f32 %v2702_v0, %v518_v3 }
  0xcd   : > { %v520_v5 = vmul.f32 %v519_v4, %v519_v4 }
  0xcf   : > { %v521_v6 = vsel %vm513_vm0, %v520_v5, 0.0 }
  0xd0   : > { %522 = vadd.xlane.f32.xlu0 %v521_v6 }
 0x159   : > { %v523_v9 = vpop.xlane.xlu0 %522 }
 0x15a   : > { %v524_v10 = vmul.f32 0.03125, %v523_v9 }
 0x15c   : > { %v525_v11 = vadd.f32 1e-05, %v524_v10 }
 0x15e   : > { %2348 = vrsqrt.f32 %v525_v11 }
 0x16b   : > { %v2349_v12 = vpop.eup %2348 }
 0x16c   : > { %v527_v14 = vmul.f32 %v2349_v12, %v519_v4 }
 0x16e   : > { %v534_v16 = vmul.f32 %v2046_v13, %v527_v14 }
 0x170   : > { %v541_v17 = vadd.f32 %v2047_v15, %v534_v16 }
 0x172   : > { %v542_v18 = vpack.c.bf16 %v541_v17, %v541_v17 }
 0x174   : > { %544 = vst.msk [vmem:[#allocation2] sm:$0xf] %vm543_vm2, %v542_v18  ;;  %2241 = vmatprep.subr.msk.bf16.mxu0 %vm513_vm0, %v542_v18  ;;  %v566_v19 = vsel %vm513_vm0, %v542_v18, 0 }
 0x175   : > { %2136 = vmatpush3.bf16.xpose.msra.mxu0 %v566_v19 }
 0x176   : > { %2141 = vmatprep.subr.bf16.mxu0 %v2512_v8 }
 0x17b   : > { %v843_v25 = vld [vmem:[#allocation2] sm:$0xf] }
 0x17c   : > { %2138 = vmatmul.mubr.msk.bf16.vlgmr.msra.gmra.mxu0 %vm513_vm0, %v2331_v20 }
 0x17d   : > { %2142 = vmatpush3.bf16.msra.mxu0 %v2332_v21  ;;  %2145 = vmatprep.mubr.msk.bf16.mxu0 %vm2513_vm1, %v2512_v8 }
 0x17e   : > { %2143 = vmatprep.subr.bf16.mxu0 %v2512_v8 }
 0x181   : > { %2144 = vmatpush3.bf16.msra.mxu0 %v2333_v22 }
 0x182   : > { %2149 = vmatprep.subr.bf16.mxu0 %v2512_v8 }
 0x184   : > { %2146 = vmatmul.mubr.msk.bf16.vlgmr.msra.gmra.mxu0 %vm513_vm0, %v542_v18 }
 0x185   : > { %2150 = vmatpush3.bf16.msra.mxu0 %v2334_v23  ;;  %2153 = vmatprep.mubr.msk.bf16.mxu0 %vm2513_vm1, %v2512_v8 }
 0x186   : > { %2151 = vmatprep.subr.bf16.mxu0 %v2512_v8 }
 0x189   : > { %2152 = vmatpush3.bf16.msra.mxu0 %v2335_v24 }
 0x18a   : > { %2163 = vmatprep.subr.bf16.mxu0 %v2512_v8 }
 0x18c   : > { %2154 = vmatmul.mubr.msk.bf16.vlgmr.msra.gmra.mxu0 %vm513_vm0, %v843_v25 }
 0x18d   : > { %2165 = vmatprep.mubr.msk.bf16.mxu0 %vm2513_vm1, %v2512_v8 }
 0x23c   : > { %v2139_v26 = vpop.f32.mrf.mxu0 }
 0x23d   : > { %v619_v27 = vpack.c.bf16 %v2139_v26, %v2139_v26 }
 0x23e   : > { %v602_v28 = vpop.f32.mrf.mxu0 }
 0x23f   : > { %624 = vst.msk [vmem:[#allocation3 + $0x8] sm:$0xf] %vm621_vm3, %v619_v27  ;;  %v617_v29 = vpack.c.bf16 %v602_v28, %v602_v28 }
 0x240   : > { %v2140_v30 = vpop.f32.mrf.mxu0 }
 0x241   : > { %622 = vst.msk [vmem:[#allocation3] sm:$0xf] %vm621_vm3, %v617_v29  ;;  %v620_v31 = vpack.c.bf16 %v2140_v30, %v2140_v30 }
 0x242   : > { %v605_v32 = vpop.f32.mrf.mxu0 }
 0x243   : > { %625 = vst.msk [vmem:[#allocation3 + $0xc] sm:$0xf] %vm621_vm3, %v620_v31  ;;  %v618_v33 = vpack.c.bf16 %v605_v32, %v605_v32 }
 0x244   : > { %v2755_v34 = vpop.f32.mrf.mxu0 }
 0x245   : > { %623 = vst.msk [vmem:[#allocation3 + $0x4] sm:$0xf] %vm621_vm3, %v618_v33 }
 0x246   : > { %v2147_v35 = vpop.f32.mrf.mxu0  ;;  %v1056_v29 = vld [vmem:[#allocation3 + $0x8] sm:$0xf] }
 0x248   : > { %v679_v36 = vpop.f32.mrf.mxu0  ;;  %v1054_v37 = vld [vmem:[#allocation3] sm:$0xf] }
 0x249   : > { %v1064_v38 = vsel %vm1062_vm4, %v1054_v37, 0  ;;  %v1156_v36 = vsel %vm1062_vm4, %v1056_v29, 0 }
 0x24a   : > { %v2148_v39 = vpop.f32.mrf.mxu0  ;;  %2158 = vmatpush3.bf16.msra.mxu1 %v1064_v38  ;;  %v1057_v30 = vld [vmem:[#allocation3 + $0xc] sm:$0xf] }
 0x24b   : > { %2169 = vmatprep.subr.bf16.mxu1 %v2512_v8  ;;  %v1202_v37 = vsel %vm1062_vm4, %v1057_v30, 0 }
 0x24c   : > { %v898_v40 = vpop.f32.mrf.mxu0  ;;  %v1055_v41 = vld [vmem:[#allocation3 + $0x4] sm:$0xf] }
 0x24d   : > { %911 = vrot.lane.b32.xlu0 %v898_v40, %s2514_s28  ;;  %905 = vrot.lane.b32.xlu1 %v898_v40, %s2515_s24  ;;  %v1110_v42 = vsel %vm1062_vm4, %v1055_v41, 0 }
 0x24e   : > { %v2155_v43 = vpop.f32.mrf.mxu0  ;;  %2164 = vmatpush3.bf16.msra.mxu0 %v1110_v42 }
 0x24f   : > { %2175 = vmatprep.subr.bf16.mxu0 %v2512_v8 }
 0x250   : > { %v901_v44 = vpop.f32.mrf.mxu0 }
 0x251   : > { %908 = vrot.lane.b32.xlu1 %v898_v40, %s2516_s20 }
 0x252   : > { %v2156_v45 = vpop.f32.mrf.mxu0 }
 0x255   : > { %683 = vrot.lane.b32.xlu1 %v2755_v34, %s2515_s24 }
 0x2bf   : > { %v912_v53 = vpop.permute.xlu0 %911  ;;  %v906_v54 = vpop.permute.xlu1 %905 }
 0x2c0   : > { %v930_v57 = vcombine.low %v906_v54, %v912_v53  ;;  %v931_v58 = vcombine.high %v906_v54, %v912_v53 }
 0x2c2   : > { %v938_v63 = vrot.slane %v930_v57, %v2765_v56  ;;  %v945_v1 = vrot.slane %v931_v58, %v2765_v56 }
 0x2c3   : > { %v909_v59 = vpop.permute.xlu1 %908 }
 0x2c4   : > { %v914_v60 = vcombine.low %v898_v40, %v909_v59  ;;  %v915_v61 = vcombine.high %v898_v40, %v909_v59 }
 0x2c6   : > { %v922_v2 = vrot.slane %v914_v60, %v2765_v56  ;;  %v929_v3 = vrot.slane %v915_v61, %v2765_v56 }
 0x2c8   : > { %v946_v4 = vcombine.low %v922_v2, %v938_v63  ;;  %v947_v5 = vcombine.high %v922_v2, %v938_v63  ;;  %v962_v6 = vcombine.low %v929_v3, %v945_v1  ;;  %v963_v7 = vcombine.high %v929_v3, %v945_v1  ;;  %v684_v1 = vpop.permute.xlu1 %683 }
 0x2ca   : > { %v954_v9 = vrot.slane %v946_v4, %v2767_v62  ;;  %v961_v10 = vrot.slane %v947_v5, %v2767_v62  ;;  %v970_v11 = vrot.slane %v962_v6, %v2767_v62  ;;  %v977_v12 = vrot.slane %v963_v7, %v2767_v62 }
 0x2cc   : > { %v982_v13 = vcombine.low %v954_v9, %v961_v10  ;;  %v2060_v14 = vcombine.high %v954_v9, %v961_v10  ;;  %v998_v15 = vcombine.low %v970_v11, %v977_v12  ;;  %v2061_v16 = vcombine.high %v970_v11, %v977_v12 }
 0x2ce   : > { %v989_v17 = vrot.slane %v982_v13, %v2765_v56  ;;  %v997_v18 = vrot.slane %v2060_v14, %v2765_v56  ;;  %v1005_v19 = vrot.slane %v998_v15, %v2765_v56  ;;  %v1013_v20 = vrot.slane %v2061_v16, %v2765_v56 }
 0x2d0   : > { %v1014_v21 = vcombine.low %v989_v17, %v997_v18  ;;  %v1030_v22 = vcombine.low %v1005_v19, %v1013_v20  ;;  %v1015_v23 = vcombine.high %v989_v17, %v997_v18  ;;  %v1031_v24 = vcombine.high %v1005_v19, %v1013_v20 }
 0x2d2   : > { %v1022_v25 = vrot.slane %v1014_v21, %v2767_v62  ;;  %v1038_v26 = vrot.slane %v1030_v22, %v2767_v62  ;;  %v1029_v33 = vrot.slane %v1015_v23, %v2767_v62  ;;  %v1045_v35 = vrot.slane %v1031_v24, %v2767_v62 }
 0x2d4   : > { %v1046_v27 = vcombine.low %v1022_v25, %v1038_v26  ;;  %v1047_v28 = vcombine.high %v1022_v25, %v1038_v26  ;;  %v1048_v38 = vcombine.low %v1029_v33, %v1045_v35  ;;  %v1049_v39 = vcombine.high %v1029_v33, %v1045_v35 }
 0x2d6   : > { %v1050_v31 = vpack.c.bf16 %v1046_v27, %v1046_v27  ;;  %v1051_v32 = vpack.c.bf16 %v1047_v28, %v1047_v28  ;;  %v1052_v40 = vpack.c.bf16 %v1048_v38, %v1048_v38  ;;  %v1053_v41 = vpack.c.bf16 %v1049_v39, %v1049_v39 }
 0x2d8   : > { %2160 = vmatmul.mubr.msk.bf16.vlgmr.msra.gmra.mxu1 %vm1058_vm5, %v1050_v31  ;;  %2166 = vmatmul.mubr.msk.bf16.vlgmr.msra.gmra.mxu0 %vm1058_vm5, %v1051_v32 }
 0x2d9   : > { %2170 = vmatpush3.bf16.msra.mxu1 %v1156_v36  ;;  %2176 = vmatpush3.bf16.msra.mxu0 %v1202_v37 }
 0x2da   : > { %2171 = vmatprep.mubr.msk.bf16.mxu1 %vm2513_vm1, %v2512_v8  ;;  %2177 = vmatprep.mubr.msk.bf16.mxu0 %vm2513_vm1, %v2512_v8 }
 0x2db   : > { %2181 = vmatprep.subr.bf16.mxu1 %v2512_v8  ;;  %2187 = vmatprep.subr.bf16.mxu0 %v2512_v8 }
 0x2e0   : > { %2172 = vmatmul.mubr.msk.bf16.vlgmr.msra.gmra.mxu1 %vm1058_vm5, %v1052_v40  ;;  %2178 = vmatmul.mubr.msk.bf16.vlgmr.msra.gmra.mxu0 %vm1058_vm5, %v1053_v41 }
 0x2e1   : > { %2183 = vmatprep.mubr.msk.bf16.mxu1 %vm2513_vm1, %v2512_v8  ;;  %2189 = vmatprep.mubr.msk.bf16.mxu0 %vm2513_vm1, %v2512_v8 }
 0x398   : > { %v1100_v42 = vpop.f32.mrf.mxu1  ;;  %v1146_v43 = vpop.f32.mrf.mxu0 }
 0x399   : > { %v1244_v44 = vsel %vm1058_vm5, %v1100_v42, -inf  ;;  %v1247_v45 = vsel %vm1058_vm5, %v1146_v43, -inf }
 0x39a   : > { %1245 = vmax.xlane.f32.xlu1 %v1244_v44  ;;  %v2161_v46 = vpop.f32.mrf.mxu1  ;;  %1248 = vmax.xlane.f32.xlu0 %v1247_v45  ;;  %v2167_v47 = vpop.f32.mrf.mxu0 }
 0x39c   : > { %v1103_v48 = vpop.f32.mrf.mxu1  ;;  %v1149_v49 = vpop.f32.mrf.mxu0 }
 0x39e   : > { %v2162_v50 = vpop.f32.mrf.mxu1  ;;  %v2168_v51 = vpop.f32.mrf.mxu0 }
 0x3a0   : > { %v2803_v52 = vpop.f32.mrf.mxu1  ;;  %v2805_v53 = vpop.f32.mrf.mxu0 }
 0x3a1   : > { %v1250_v61 = vsel %vm1058_vm5, %v2803_v52, -inf  ;;  %v1253_v63 = vsel %vm1058_vm5, %v2805_v53, -inf }
 0x3a2   : > { %v2173_v54 = vpop.f32.mrf.mxu1  ;;  %v2179_v55 = vpop.f32.mrf.mxu0 }
 0x3a4   : > { %v1195_v57 = vpop.f32.mrf.mxu1  ;;  %v1241_v58 = vpop.f32.mrf.mxu0 }
 0x3a6   : > { %v2174_v59 = vpop.f32.mrf.mxu1  ;;  %v2180_v60 = vpop.f32.mrf.mxu0 }
 0x3ab   : > { %689 = vrot.lane.b32.xlu1 %v2755_v34, %s2514_s28 }
 0x3b0   : > { %686 = vrot.lane.b32.xlu0 %v2755_v34, %s2516_s20  ;;  %s2949_s20 = scalar_lea.hbm %s3010_s14, %s2092_s25 }
 0x3cf   : > { %1251 = vmax.xlane.f32.xlu1 %v1250_v61  ;;  %1254 = vmax.xlane.f32.xlu0 %v1253_v63 }
 0x423   : > { %v1246_v2 = vpop.xlane.xlu1 %1245  ;;  %v1249_v3 = vpop.xlane.xlu0 %1248 }
 0x424   : > { %v1256_v4 = vsub.f32 %v1100_v42, %v1246_v2  ;;  %v1257_v5 = vsub.f32 %v1146_v43, %v1249_v3 }
 0x426   : > { %v1260_v6 = vpack.c.bf16 %v1256_v4, %v1256_v4  ;;  %v1261_v7 = vpack.c.bf16 %v1257_v5, %v1257_v5 }
 0x427   : > { %v690_v9 = vpop.permute.xlu1 %689  ;;  %v687_v10 = vpop.permute.xlu0 %686 }
 0x428   : > { %v1265_v11 = vmul.bf16 1069105081, %v1260_v6  ;;  %v1268_v12 = vmul.bf16 1069105081, %v1261_v7  ;;  %v708_v13 = vcombine.low %v684_v1, %v690_v9  ;;  %v709_v14 = vcombine.high %v684_v1, %v690_v9 }
 0x429   : > { %v692_v15 = vcombine.low %v2755_v34, %v687_v10  ;;  %v693_v16 = vcombine.high %v2755_v34, %v687_v10 }
 0x42a   : > { %2350 = vpow.bf16 %v1265_v11  ;;  %v716_v17 = vrot.slane %v708_v13, %v2765_v56  ;;  %v723_v18 = vrot.slane %v709_v14, %v2765_v56 }
 0x42b   : > { %2352 = vpow.bf16 %v1268_v12  ;;  %v700_v19 = vrot.slane %v692_v15, %v2765_v56  ;;  %v707_v20 = vrot.slane %v693_v16, %v2765_v56 }
 0x42d   : > { %v724_v21 = vcombine.low %v700_v19, %v716_v17  ;;  %v725_v22 = vcombine.high %v700_v19, %v716_v17  ;;  %v740_v23 = vcombine.low %v707_v20, %v723_v18  ;;  %v741_v24 = vcombine.high %v707_v20, %v723_v18 }
 0x42f   : > { %v732_v25 = vrot.slane %v724_v21, %v2767_v62  ;;  %v739_v26 = vrot.slane %v725_v22, %v2767_v62  ;;  %v748_v34 = vrot.slane %v740_v23, %v2767_v62  ;;  %v755_v27 = vrot.slane %v741_v24, %v2767_v62 }
 0x431   : > { %v760_v28 = vcombine.low %v732_v25, %v739_v26  ;;  %v2055_v29 = vcombine.high %v732_v25, %v739_v26  ;;  %v776_v30 = vcombine.low %v748_v34, %v755_v27  ;;  %v2056_v31 = vcombine.high %v748_v34, %v755_v27 }
 0x433   : > { %v767_v32 = vrot.slane %v760_v28, %v2765_v56  ;;  %v775_v33 = vrot.slane %v2055_v29, %v2765_v56  ;;  %v783_v35 = vrot.slane %v776_v30, %v2765_v56  ;;  %v791_v36 = vrot.slane %v2056_v31, %v2765_v56 }
 0x435   : > { %v792_v37 = vcombine.low %v767_v32, %v775_v33  ;;  %v793_v38 = vcombine.high %v767_v32, %v775_v33  ;;  %v808_v39 = vcombine.low %v783_v35, %v791_v36  ;;  %v809_v40 = vcombine.high %v783_v35, %v791_v36 }
 0x437   : > { %v800_v41 = vrot.slane %v792_v37, %v2767_v62  ;;  %v807_v42 = vrot.slane %v793_v38, %v2767_v62  ;;  %v816_v43 = vrot.slane %v808_v39, %v2767_v62  ;;  %v823_v44 = vrot.slane %v809_v40, %v2767_v62 }
 0x438   : > { %v2351_v45 = vpop.eup %2350 }
 0x439   : > { %v2353_v46 = vpop.eup %2352  ;;  %v824_v47 = vcombine.low %v800_v41, %v816_v43  ;;  %v825_v48 = vcombine.high %v800_v41, %v816_v43  ;;  %v826_v49 = vcombine.low %v807_v42, %v823_v44  ;;  %v827_v50 = vcombine.high %v807_v42, %v823_v44 }
 0x43a   : > { %v1276_v51 = vunpack.c.l.bf16 %v2351_v45  ;;  %v1277_v60 = vunpack.c.l.bf16 %v2353_v46 }
 0x43b   : > { %v828_v54 = vpack.c.bf16 %v824_v47, %v824_v47  ;;  %v829_v55 = vpack.c.bf16 %v825_v48, %v825_v48  ;;  %v830_v57 = vpack.c.bf16 %v826_v49, %v826_v49  ;;  %v831_v58 = vpack.c.bf16 %v827_v50, %v827_v50 }
 0x43c   : > { %v1280_v59 = vsel %vm1058_vm5, %v1276_v51, 0.0  ;;  %v1283_v61 = vsel %vm1058_vm5, %v1277_v60, 0.0 }
 0x43d   : > { %832 = vst.msk [vmem:[#allocation4] sm:$0xf] %vm621_vm3, %v828_v54  ;;  %833 = vst.msk [vmem:[#allocation4 + $0x4] sm:$0xf] %vm621_vm3, %v829_v55  ;;  %1281 = vadd.xlane.f32.xlu1 %v1280_v59 }
 0x43e   : > { %834 = vst.msk [vmem:[#allocation4 + $0x8] sm:$0xf] %vm621_vm3, %v830_v57  ;;  %835 = vst.msk [vmem:[#allocation4 + $0xc] sm:$0xf] %vm621_vm3, %v831_v58 }
 0x441   : > { %1284 = vadd.xlane.f32.xlu1 %v1283_v61 }
 0x444   : > { %v1296_v63 = vld [vmem:[#allocation4] sm:$0xf]  ;;  %v1297_v1 = vld [vmem:[#allocation4 + $0x4] sm:$0xf] }
 0x445   : > { %v1304_v2 = vsel %vm1062_vm4, %v1296_v63, 0  ;;  %v1350_v3 = vsel %vm1062_vm4, %v1297_v1, 0  ;;  %v1298_v4 = vld [vmem:[#allocation4 + $0x8] sm:$0xf]  ;;  %v1299_v5 = vld [vmem:[#allocation4 + $0xc] sm:$0xf] }
 0x446   : > { %2182 = vmatpush3.bf16.msra.mxu1 %v1304_v2  ;;  %2188 = vmatpush3.bf16.msra.mxu0 %v1350_v3  ;;  %v1396_v6 = vsel %vm1062_vm4, %v1298_v4, 0  ;;  %v1442_v7 = vsel %vm1062_vm4, %v1299_v5, 0  ;;  %v2336_v2 = vld [vmem:[%s3002_s6 + $0x8] sm:$0xff]  }
 0x447   : > { %2193 = vmatprep.subr.bf16.mxu1 %v2512_v8  ;;  %2199 = vmatprep.subr.bf16.mxu0 %v2512_v8 }
 0x449   : > { %2184 = vmatmul.mubr.msk.bf16.vlgmr.msra.gmra.mxu1 %vm1058_vm5, %v2351_v45  ;;  %2190 = vmatmul.mubr.msk.bf16.vlgmr.msra.gmra.mxu0 %vm1058_vm5, %v2353_v46 }
 0x44a   : > { %2194 = vmatpush3.bf16.msra.mxu1 %v1396_v6  ;;  %2200 = vmatpush3.bf16.msra.mxu0 %v1442_v7 }
 0x44b   : > { %2195 = vmatprep.mubr.msk.bf16.mxu1 %vm2513_vm1, %v2512_v8  ;;  %2201 = vmatprep.mubr.msk.bf16.mxu0 %vm2513_vm1, %v2512_v8 }
 0x44c   : > { %2205 = vmatprep.subr.bf16.mxu1 %v2512_v8  ;;  %2213 = vmatprep.subr.bf16.mxu0 %v2512_v8 }
 0x458   : > { %v1252_v9 = vpop.xlane.xlu1 %1251  ;;  %v1255_v10 = vpop.xlane.xlu0 %1254 }
 0x459   : > { %v1258_v11 = vsub.f32 %v2803_v52, %v1252_v9  ;;  %v1259_v12 = vsub.f32 %v2805_v53, %v1255_v10 }
 0x45b   : > { %v1262_v13 = vpack.c.bf16 %v1258_v11, %v1258_v11  ;;  %v1263_v14 = vpack.c.bf16 %v1259_v12, %v1259_v12  ;;  %v2337_v12 = vld [vmem:[%s3002_s6] sm:$0xff]  }
 0x45d   : > { %v1271_v15 = vmul.bf16 1069105081, %v1262_v13  ;;  %v1274_v16 = vmul.bf16 1069105081, %v1263_v14 }
 0x45f   : > { %2354 = vpow.bf16 %v1271_v15 }
 0x460   : > { %2356 = vpow.bf16 %v1274_v16 }
 0x46d   : > { %v2355_v17 = vpop.eup %2354 }
 0x46e   : > { %v2357_v18 = vpop.eup %2356  ;;  %2196 = vmatmul.mubr.msk.bf16.vlgmr.msra.gmra.mxu1 %vm1058_vm5, %v2355_v17  ;;  %v1278_v19 = vunpack.c.l.bf16 %v2355_v17 }
 0x46f   : > { %2202 = vmatmul.mubr.msk.bf16.vlgmr.msra.gmra.mxu0 %vm1058_vm5, %v2357_v18  ;;  %2209 = vmatprep.mubr.msk.bf16.mxu1 %vm2513_vm1, %v2512_v8  ;;  %v1279_v20 = vunpack.c.l.bf16 %v2357_v18 }
 0x470   : > { %v1286_v52 = vsel %vm1058_vm5, %v1278_v19, 0.0  ;;  %2217 = vmatprep.mubr.msk.bf16.mxu0 %vm2513_vm1, %v2512_v8  ;;  %2206 = vmatpush3.bf16.msra.mxu1 %v2336_v2  ;;  %v2345_v2 = vld [vmem:[%s3008_s12 + $0x10] sm:$0xff]  }
 0x471   : > { %1287 = vadd.xlane.f32.xlu1 %v1286_v52  ;;  %v1289_v53 = vsel %vm1058_vm5, %v1279_v20, 0.0  ;;  %2207 = vmatprep.subr.bf16.mxu1 %v2512_v8 }
 0x474   : > { %2208 = vmatpush3.bf16.msra.mxu1 %v2337_v12 }
 0x475   : > { %1290 = vadd.xlane.f32.xlu1 %v1289_v53  ;;  %2221 = vmatprep.subr.bf16.mxu1 %v2512_v8 }
 0x4c6   : > { %v1282_v34 = vpop.xlane.xlu1 %1281 }
 0x4c7   : > { %2358 = vrcp.f32 %v1282_v34 }
 0x4ca   : > { %v1285_v29 = vpop.xlane.xlu1 %1284 }
 0x4cb   : > { %2360 = vrcp.f32 %v1285_v29 }
 0x4d4   : > { %v2359_v32 = vpop.eup %2358 }
 0x4d8   : > { %v2361_v33 = vpop.eup %2360 }
 0x4fa   : > { %v1288_v30 = vpop.xlane.xlu1 %1287 }
 0x4fb   : > { %2362 = vrcp.f32 %v1288_v30 }
 0x4fe   : > { %v1291_v31 = vpop.xlane.xlu1 %1290 }
 0x4ff   : > { %2364 = vrcp.f32 %v1291_v31  ;;  %v2072_v31 = vld [vmem:[%s3003_s7] ss:$0 sm:$0xff] }
 0x508   : > { %v2363_v35 = vpop.eup %2362 }
 0x509   : > { %v1340_v21 = vpop.f32.mrf.mxu1  ;;  %v1386_v22 = vpop.f32.mrf.mxu0 }
 0x50a   : > { %v1484_v38 = vmul.f32 %v2359_v32, %v1340_v21  ;;  %v1485_v41 = vmul.f32 %v2361_v33, %v1386_v22 }
 0x50b   : > { %v2185_v23 = vpop.f32.mrf.mxu1  ;;  %v2191_v24 = vpop.f32.mrf.mxu0 }
 0x50c   : > { %v2365_v37 = vpop.eup %2364 }
 0x50d   : > { %v1343_v25 = vpop.f32.mrf.mxu1  ;;  %v1389_v26 = vpop.f32.mrf.mxu0 }
 0x50f   : > { %v2186_v27 = vpop.f32.mrf.mxu1  ;;  %v2192_v28 = vpop.f32.mrf.mxu0 }
 0x52e   : > { %v1432_v36 = vpop.f32.mrf.mxu1 }
 0x52f   : > { %v1486_v39 = vmul.f32 %v2363_v35, %v1432_v36  ;;  %v1478_v40 = vpop.f32.mrf.mxu0 }
 0x530   : > { %v1487_v42 = vmul.f32 %v2365_v37, %v1478_v40  ;;  %v2197_v43 = vpop.f32.mrf.mxu1 }
 0x531   : > { %v1488_v44 = vcombine.low %v1484_v38, %v1486_v39  ;;  %v1489_v45 = vcombine.high %v1484_v38, %v1486_v39  ;;  %v2203_v46 = vpop.f32.mrf.mxu0 }
 0x532   : > { %v1504_v47 = vcombine.low %v1485_v41, %v1487_v42  ;;  %v1505_v48 = vcombine.high %v1485_v41, %v1487_v42  ;;  %v1435_v49 = vpop.f32.mrf.mxu1  ;;  %v2339_v46 = vld [vmem:[#allocation5] sm:$0xff]  }
 0x533   : > { %v1496_v50 = vrot.slane %v1488_v44, %v2765_v56  ;;  %v1503_v51 = vrot.slane %v1489_v45, %v2765_v56  ;;  %v1481_v54 = vpop.f32.mrf.mxu0  ;;  %v2338_v45 = vld [vmem:[#allocation5 + $0x8] sm:$0xff]  }
 0x534   : > { %v1512_v55 = vrot.slane %v1504_v47, %v2765_v56  ;;  %v1519_v57 = vrot.slane %v1505_v48, %v2765_v56  ;;  %v2198_v58 = vpop.f32.mrf.mxu1  ;;  %2214 = vmatpush3.bf16.msra.mxu0 %v2338_v45  ;;  %v2341_v47 = vld [vmem:[%s3008_s12 + $0x30] sm:$0xff]   ;;  %v2076_v54 = vld [vmem:[%s3004_s8] ss:$0 sm:$0xff] }
 0x535   : > { %v2204_v59 = vpop.f32.mrf.mxu0  ;;  %2215 = vmatprep.subr.bf16.mxu0 %v2512_v8 }
 0x536   : > { %v1520_v60 = vcombine.low %v1496_v50, %v1512_v55  ;;  %v1521_v61 = vcombine.high %v1496_v50, %v1512_v55  ;;  %v1536_v63 = vcombine.low %v1503_v51, %v1519_v57  ;;  %v1537_v1 = vcombine.high %v1503_v51, %v1519_v57  ;;  %v2077_v57 = vld [vmem:[%s3005_s9] ss:$0 sm:$0xff] }
 0x538   : > { %v1528_v3 = vrot.slane %v1520_v60, %v2767_v62  ;;  %v1535_v4 = vrot.slane %v1521_v61, %v2767_v62  ;;  %v1544_v5 = vrot.slane %v1536_v63, %v2767_v62  ;;  %v1551_v6 = vrot.slane %v1537_v1, %v2767_v62  ;;  %2216 = vmatpush3.bf16.msra.mxu0 %v2339_v46  ;;  %v2342_v61 = vld [vmem:[%s3008_s12 + $0x28] sm:$0xff]   ;;  %v2343_v63 = vld [vmem:[%s3008_s12 + $0x20] sm:$0xff]   ;;  %v2344_v1 = vld [vmem:[%s3008_s12 + $0x18] sm:$0xff]  }
 0x53a   : > { %v1556_v7 = vcombine.low %v1528_v3, %v1535_v4  ;;  %v2070_v9 = vcombine.high %v1528_v3, %v1535_v4  ;;  %v1572_v10 = vcombine.low %v1544_v5, %v1551_v6  ;;  %v2071_v11 = vcombine.high %v1544_v5, %v1551_v6  ;;  %v2346_v3 = vld [vmem:[%s3008_s12 + $0x8] sm:$0xff]   ;;  %v2347_v4 = vld [vmem:[%s3008_s12] sm:$0xff]   ;;  %v2078_v5 = vld [vmem:[#allocation8] ss:$0 sm:$0xff] }
 0x53c   : > { %v1563_v13 = vrot.slane %v1556_v7, %v2765_v56  ;;  %v1571_v14 = vrot.slane %v2070_v9, %v2765_v56  ;;  %v1579_v15 = vrot.slane %v1572_v10, %v2765_v56  ;;  %v1587_v16 = vrot.slane %v2071_v11, %v2765_v56 }
 0x53e   : > { %v1589_v17 = vcombine.high %v1563_v13, %v1571_v14  ;;  %v1605_v18 = vcombine.high %v1579_v15, %v1587_v16  ;;  %v1588_v19 = vcombine.low %v1563_v13, %v1571_v14  ;;  %v1604_v52 = vcombine.low %v1579_v15, %v1587_v16 }
 0x540   : > { %v1603_v20 = vrot.slane %v1589_v17, %v2767_v62  ;;  %v1619_v53 = vrot.slane %v1605_v18, %v2767_v62  ;;  %v1596_v21 = vrot.slane %v1588_v19, %v2767_v62  ;;  %v1612_v22 = vrot.slane %v1604_v52, %v2767_v62  ;;  %v2090_v18 = vld [vmem:[%s3009_s13] ss:$0 sm:$0xff] }
 0x542   : > { %v1622_v23 = vcombine.low %v1603_v20, %v1619_v53  ;;  %v1621_v24 = vcombine.high %v1596_v21, %v1612_v22  ;;  %v1620_v25 = vcombine.low %v1596_v21, %v1612_v22  ;;  %v1623_v56 = vcombine.high %v1603_v20, %v1619_v53 }
 0x544   : > { %1629 = vrot.lane.b32.xlu1 %v1622_v23, %s2519_s17  ;;  %1625 = vrot.lane.b32.xlu0 %v1621_v24, %s2520_s18  ;;  %s2044_s17 = sshll.u32 %s498_s15, 3 }
 0x545   : > { %s500_s26 = scalar_lea.vmem [#allocation10], %s2044_s17  ;;  %s2428_s17 = scalar_lea.vmem %s2427_s29, 256 }
 0x546   : > { %s1941_s27 = sshll.u32 %s500_s26, 4  ;;  %s2951_s27 = int_to_ptr.vmem [resolvable:$true] %s1941_s27 }
 0x547   : > { %s2422_s22 = scalar_lea.vmem %s2951_s27, 128  ;;  %p2429_p0 = scmp.lt.s32.totalorder %s2951_s27, %s2427_s29 }
 0x548   : > { %1633 = vrot.lane.b32.xlu1 %v1623_v56, %s2521_s21  ;;  %p2423_p10 = scmp.ne.s32.totalorder %s2951_s27, %s2422_s22  ;;  %p2430_p7 = scmp.lt.s32.totalorder %s2428_s17, %s2422_s22 }
 0x54a   : > { %p2424_p11 = pnand %p2423_p10, %p2638_p4  ;;  %p2431_p9 = por %p2430_p7, %p2429_p0 }
 0x54c   : > { %p2425_p13 = pneg %p2424_p11 }
 0x54e   : > { %p2432_p12 = pnand %p2431_p9, %p2425_p13 }
 0x5b6   : > { %v1630_v26 = vpop.permute.xlu1 %1629  ;;  %v1626_v34 = vpop.permute.xlu0 %1625 }
 0x5b7   : > { %v1636_v27 = vsel %vm1058_vm5, %v1620_v25, %v1626_v34 }
 0x5b8   : > { %v1638_v29 = vsel %vm1637_vm6, %v1636_v27, %v1630_v26 }
 0x5ba   : > { %v1634_v28 = vpop.permute.xlu1 %1633 }
 0x5bb   : > { %v1640_v30 = vsel %vm1639_vm7, %v1638_v29, %v1634_v28 }
 0x5bc   : > { %v1641_v62 = vpack.c.bf16 %v1640_v30, %v1640_v30 }
 0x5be   : > { %2210 = vmatmul.mubr.msk.bf16.vlgmr.msra.gmra.mxu1 %vm513_vm0, %v1641_v62 }
 0x5bf   : > { %2237 = vmatprep.mubr.msk.bf16.mxu1 %vm2513_vm1, %v2512_v8 }
 0x67e   : > { %v1702_v32 = vpop.f32.mrf.mxu1 }
 0x67f   : > { %v1703_v33 = vadd.f32 %v2072_v31, %v1702_v32 }
 0x680   : > { %v2211_v35 = vpop.f32.mrf.mxu1 }
 0x681   : > { %v2895_v36 = vadd.f32 %v1703_v33, %v2702_v0  ;;  %v2340_v0 = vld [vmem:[%s3008_s12 + $0x38] sm:$0xff]  }
 0x682   : > { %v1705_v37 = vpop.f32.mrf.mxu1  ;;  %2222 = vmatpush3.bf16.msra.mxu1 %v2340_v0 }
 0x683   : > { %v1711_v38 = vsel %vm513_vm0, %v2895_v36, 0.0  ;;  %2223 = vmatprep.subr.bf16.mxu1 %v2512_v8 }
 0x684   : > { %1712 = vadd.xlane.f32.xlu0 %v1711_v38  ;;  %v2212_v39 = vpop.f32.mrf.mxu1 }
 0x686   : > { %2224 = vmatpush3.bf16.msra.mxu1 %v2341_v47 }
 0x687   : > { %2225 = vmatprep.subr.bf16.mxu1 %v2512_v8 }
 0x68a   : > { %2226 = vmatpush3.bf16.msra.mxu1 %v2342_v61 }
 0x68b   : > { %2227 = vmatprep.subr.bf16.mxu1 %v2512_v8 }
 0x68e   : > { %2228 = vmatpush3.bf16.msra.mxu1 %v2343_v63 }
 0x68f   : > { %2229 = vmatprep.subr.bf16.mxu1 %v2512_v8 }
 0x692   : > { %2230 = vmatpush3.bf16.msra.mxu1 %v2344_v1 }
 0x693   : > { %2231 = vmatprep.subr.bf16.mxu1 %v2512_v8 }
 0x696   : > { %2232 = vmatpush3.bf16.msra.mxu1 %v2345_v2 }
 0x697   : > { %2233 = vmatprep.subr.bf16.mxu1 %v2512_v8 }
 0x69a   : > { %2234 = vmatpush3.bf16.msra.mxu1 %v2346_v3 }
 0x69b   : > { %2235 = vmatprep.subr.bf16.mxu1 %v2512_v8 }
 0x69e   : > { %2236 = vmatpush3.bf16.msra.mxu1 %v2347_v4 }
 0x70d   : > { %v1713_v40 = vpop.xlane.xlu0 %1712 }
 0x70e   : > { %v1715_v41 = vmul.f32 0.03125, %v1713_v40 }
 0x710   : > { %v1716_v42 = vsub.f32 %v2895_v36, %v1715_v41 }
 0x712   : > { %v1717_v43 = vmul.f32 %v1716_v42, %v1716_v42 }
 0x714   : > { %v1718_v44 = vsel %vm513_vm0, %v1717_v43, 0.0 }
 0x715   : > { %1719 = vadd.xlane.f32.xlu1 %v1718_v44 }
 0x79e   : > { %v1720_v48 = vpop.xlane.xlu1 %1719 }
 0x79f   : > { %v1721_v49 = vmul.f32 0.03125, %v1720_v48 }
 0x7a1   : > { %v1722_v50 = vadd.f32 1e-05, %v1721_v49 }
 0x7a3   : > { %2366 = vrsqrt.f32 %v1722_v50 }
 0x7b0   : > { %v2367_v51 = vpop.eup %2366 }
 0x7b1   : > { %v1724_v55 = vmul.f32 %v2367_v51, %v1716_v42 }
 0x7b3   : > { %v1731_v58 = vmul.f32 %v2076_v54, %v1724_v55 }
 0x7b5   : > { %v1738_v59 = vadd.f32 %v2077_v57, %v1731_v58 }
 0x7b7   : > { %v1739_v60 = vpack.c.bf16 %v1738_v59, %v1738_v59 }
 0x7b9   : > { %2218 = vmatmul.mubr.msk.bf16.vlgmr.msra.gmra.mxu0 %vm513_vm0, %v1739_v60 }
 0x879   : > { %v1800_v6 = vpop.f32.mrf.mxu0 }
 0x87a   : > { %v1801_v7 = vadd.f32 %v2078_v5, %v1800_v6 }
 0x87b   : > { %v2219_v9 = vpop.f32.mrf.mxu0 }
 0x87c   : > { %v1807_v10 = vmul.f32 0.70710677, %v1801_v7  ;;  %v1806_v14 = vmul.f32 0.5, %v1801_v7 }
 0x87d   : > { %v1803_v11 = vpop.f32.mrf.mxu0 }
 0x87e   : > { %2368 = verf.f32 %v1807_v10 }
 0x87f   : > { %v2220_v12 = vpop.f32.mrf.mxu0 }
 0x88b   : > { %v2369_v13 = vpop.eup %2368 }
 0x88c   : > { %v1809_v15 = vadd.f32 1.0, %v2369_v13 }
 0x88e   : > { %v1810_v16 = vmul.f32 %v1809_v15, %v1806_v14 }
 0x890   : > { %v1811_v8 = vpack.c.bf16 %v1810_v16, %v1810_v16 }
 0x892   : > { %2238 = vmatmul.mubr.bf16.vlgmr.msra.gmra.mxu1 %v1811_v8 }
 0x952   : > { %v1910_v17 = vpop.f32.mrf.mxu1 }
 0x953   : > { %v1916_v19 = vadd.f32 %v1910_v17, %v2895_v36 }
 0x954   : > { %v2239_v52 = vpop.f32.mrf.mxu1 }
 0x955   : > { %v1924_v20 = vadd.f32 %v2090_v18, %v1916_v19 }
 0x956   : > { %v1913_v53 = vpop.f32.mrf.mxu1 }
 0x957   : > { %1925 = vst.msk [vmem:[%s500_s26] sm:$0xff] %vm513_vm0, %v1924_v20 }
 0x958   : > { %v2240_v21 = vpop.f32.mrf.mxu1 }
 0x959   : > { %2435 = shalt.err (!%p2432_p12)
}
 0x95a   : > { %s2436_s18 = scalar_lea.hbm %s2949_s20, 128  ;;  %s2440_s25 = scalar_lea.hbm %s3010_s14, 256 }
 0x95b   : > { %p2437_p1 = scmp.ne.s32.totalorder %s2949_s20, %s2436_s18  ;;  %p2441_p3 = scmp.lt.s32.totalorder %s2949_s20, %s3010_s14 }
 0x95c   : > { %p2442_p6 = scmp.lt.s32.totalorder %s2440_s25, %s2436_s18 }
 0x95d   : > { %p2438_p2 = pnand %p2437_p1, %p2638_p4 }
 0x95e   : > { %p2443_p8 = por %p2442_p6, %p2441_p3 }
 0x95f   : > { %p2439_p5 = pneg %p2438_p2 }
 0x961   : > { %p2444_p10 = pnand %p2443_p8, %p2439_p5 }
 0x963   : > { %2447 = shalt.err (!%p2444_p10)
}
 0x964   : > { %2250 = dma.vmem_to_hbm [thread:$0]  (%p2638_p4), %s2951_s27, 128, %s2949_s20, %s1927_s16  }
 0x965 PF: > { %s3030_s24 = sld [smem:[#allocation17_spill]] }
 0x966   : > { %s3031_s22 = sld [smem:[#allocation14_spill]] }
 0x967   : > { %s3032_s19 = sld [smem:[#allocation19_spill]] }
 0x96b   : > { %p2267_p11 = scmp.ge.s32.totalorder %s3030_s24, 2 }
 0x96c   : > { %s1953_s29 = sand.u32 1, %s3031_s22  }
 0x96d   : > { %p3033_p13 = scmp.ne.s32.totalorder %s3032_s19, 0  ;;  %s1954_s17 = scalar_lea.sflag [#allocation7], %s1953_s29 }
 0x96f   : > { %p2260_p0 = pnand %p2267_p11, %p3033_p13 }
 0x971   : > { %p2261_p7 = pneg %p2260_p0 }
 0x973   : > { %2481 = dma.done.wait (%p2261_p7), %s1954_s17, 128  }
 0x974   : > { %2483 = vsyncadd (%p2261_p7), %s1954_s17, 4294967168  ;;  %s29_s18 = sadd.s32 1, %s3030_s24   ;;  %s3034_s23 = sld [smem:[#allocation15_spill]] }
 0x975   : > { %p26_p9 = scmp.ge.s32.totalorder %s29_s18, 4   ;;  %s3035_s15 = sld [smem:[#allocation20_spill]] }
 0x976   : > { %s3036_s16 = sld [smem:[#allocation16_spill]]  ;;  %s3038_s29 = smov %s2490_s30 }
 0x977   : > { %s3037_s17 = sld [smem:[#allocation18_spill]]  ;;  %28 = sbr.rel (!%p26_p9) target bundleno = 6 (0x6), region = 126 }
 0x97a   : > { %s3039_s30 = smov %s3034_s23 }
 0x97c   :  { %1959 = vsyncpa [#allocation6], 1 }
 0x97d   :  { %1961 = vsyncpa [#allocation6 + $0x1], 1 }
 0x97e   :  { %1962 = vsyncpa [#allocation9], 1 }
 0x97f   :  { %1963 = vsyncpa [#allocation7], 1 }
 0x980   :  { %1965 = vsyncpa [#allocation7 + $0x1], 1 }

</bundles_post_ra>
